<compile_context>
chip_gen: v6e
topology: v6e:2x2x1
jax: 0.10.0
libtpu: 0.0.40
codegen_flags: <defaults>
</compile_context>

<pallas_src>
import functools

import jax
import jax.numpy as jnp
from jax.experimental import pallas as pl
from jax.experimental.pallas import tpu as pltpu


def _round_up(n, m):
    return ((n + m - 1) // m) * m


def _vmem_capacity_bytes():
    try:
        info = pltpu.get_tpu_info()
        cap = getattr(info, "vmem_capacity_bytes", None)
        if cap:
            return int(cap)
    except Exception:
        pass
    return 64 * 1024 * 1024  # conservative (v7x per-TC size)


def _choose_tk(D, max_tk):
    """Feature-tile size: full D when small, else a 128-multiple divisor of D."""
    if D <= max_tk:
        return D
    if D % 128 == 0:
        start = max_tk - (max_tk % 128)
        for tk in range(start, 127, -128):
            if D % tk == 0:
                return tk
    return D  # fallback: single K block (block dim == full array dim is legal)


def _meta_kernel(x_ref,               # (TB, TK)  native dtype (f32)
                 wh_ref, bh_ref,      # (TK, 21) bf16, (1, 21) f32
                 fc1w_ref, fc1b_ref,  # (21, 128), (1, 128) f32
                 fc2w_ref, fc2b_ref,  # (128, 64), (1, 64)  f32
                 fc3w_ref, fc3b_ref,  # (64, 128), (1, 128) f32 (lane-padded)
                 out_ref,             # (TB, 128) f32 (lane-dense store)
                 acc_ref):            # (TB, 21)  f32 scratch accumulator
    k = pl.program_id(1)

    @pl.when(k == 0)
    def _init():
        acc_ref[...] = jnp.zeros_like(acc_ref)

    # Cast x to bf16 in-kernel (VPU work under DMA slack); f32 MXU accumulation.
    x = x_ref[...].astype(jnp.bfloat16)
    acc_ref[...] += jnp.dot(x, wh_ref[...], preferred_element_type=jnp.float32)

    @pl.when(k == pl.num_programs(1) - 1)
    def _finalize():
        logits = acc_ref[...] + bh_ref[...]                      # (TB, 21)

        # Segmented softmax over the three 7-wide lane segments
        # (== softmax(dim=1) of each head, laid out as [p1 | p2 | p3]).
        col = jax.lax.broadcasted_iota(jnp.int32, logits.shape, 1)
        in0 = col < 7
        in1 = jnp.logical_and(col >= 7, col < 14)
        neg_inf = jnp.float32(-jnp.inf)

        m0 = jnp.max(jnp.where(in0, logits, neg_inf), axis=1, keepdims=True)
        m1 = jnp.max(jnp.where(in1, logits, neg_inf), axis=1, keepdims=True)
        m2 = jnp.max(jnp.where(jnp.logical_or(in0, in1), neg_inf, logits),
                     axis=1, keepdims=True)
        m = jnp.where(in0, m0, jnp.where(in1, m1, m2))

        e = jnp.exp(logits - m)                                  # EUP
        s0 = jnp.sum(jnp.where(in0, e, 0.0), axis=1, keepdims=True)
        s1 = jnp.sum(jnp.where(in1, e, 0.0), axis=1, keepdims=True)
        s2 = jnp.sum(jnp.where(jnp.logical_or(in0, in1), 0.0, e),
                     axis=1, keepdims=True)
        s = jnp.where(in0, s0, jnp.where(in1, s1, s2))
        p_cat = e * pl.reciprocal(s, approx=True)                # (TB, 21)

        # MetaLearner head: fc1 -> ReLU -> fc2 -> ReLU -> fc3 (lane-dense out).
        h1 = jnp.dot(p_cat, fc1w_ref[...],
                     preferred_element_type=jnp.float32) + fc1b_ref[...]
        h1 = jnp.maximum(h1, 0.0)
        h2 = jnp.dot(h1, fc2w_ref[...],
                     preferred_element_type=jnp.float32) + fc2b_ref[...]
        h2 = jnp.maximum(h2, 0.0)
        out = jnp.dot(h2, fc3w_ref[...],
                      preferred_element_type=jnp.float32) + fc3b_ref[...]
        out_ref[...] = out.astype(out_ref.dtype)


def prepare_params(params):
    """One-time (hoisted) fusion/casting/padding of the weights."""
    w_heads = jnp.concatenate(
        [params["wA"], params["wB"], params["wC"]], axis=1).astype(jnp.bfloat16)
    b_heads = jnp.concatenate(
        [params["bA"], params["bB"], params["bC"]], axis=1).astype(jnp.float32)
    # Lane-dense output: pad fc3 to 128 output lanes (lanes 7..127 are zero).
    fc3_w = jnp.pad(params["fc3_w"].astype(jnp.float32), ((0, 0), (0, 121)))
    fc3_b = jnp.pad(params["fc3_b"].astype(jnp.float32), ((0, 0), (0, 121)))
    return {
        "w_heads": w_heads, "b_heads": b_heads,
        "fc1_w": params["fc1_w"].astype(jnp.float32),
        "fc1_b": params["fc1_b"].astype(jnp.float32),
        "fc2_w": params["fc2_w"].astype(jnp.float32),
        "fc2_b": params["fc2_b"].astype(jnp.float32),
        "fc3_w": fc3_w, "fc3_b": fc3_b,
    }


def meta_learner_forward(x_nchw, fused, *, single_buffer_weights=True,
                         max_tb=1024, max_tk=8192):
    """x_nchw: (B, C, H, W).  Returns (B, 7) float32."""
    B = x_nchw.shape[0]
    x = x_nchw.reshape(B, -1)          # native dtype; no wrapper-side cast/pad
    D = x.shape[1]

    # --- tiling / VMEM budget (per-generation) -----------------------------
    TK = _choose_tk(D, max_tk)
    num_k = D // TK

    vmem_cap = _vmem_capacity_bytes()
    vmem_limit = max(32 << 20, min(vmem_cap * 3 // 4, 112 << 20))

    x_itemsize = jnp.dtype(x.dtype).itemsize
    # Resident weights, lane-padded to 128 lanes, worst-case double-buffered.
    wh_rows = _round_up(TK, 16)
    weights_bytes = (2 * wh_rows * 128 * 2 +
                     2 * (128 + 24 * 128 + 128 + 128 * 128 + 128 + 64 * 128 + 128) * 4)
    # Per batch-row: double-buffered x block + double-buffered out + accumulator.
    per_row = 2 * TK * x_itemsize + 2 * 128 * 4 + 128 * 4
    avail = vmem_limit - weights_bytes - (4 << 20)
    tb_cap = max(8, (avail // per_row) // 8 * 8) if avail > 0 else 8
    TB = int(min(max_tb, _round_up(B, 8), tb_cap))

    grid = (pl.cdiv(B, TB), num_k)     # batch remainder -> masked partial tile

    # --- specs --------------------------------------------------------------
    def const2(i, k):
        return (0, 0)

    if single_buffer_weights:
        def cspec(shape):
            return pl.BlockSpec(shape, const2, pipeline_mode=pl.Buffered(1))
    else:
        def cspec(shape):
            return pl.BlockSpec(shape, const2)

    if num_k == 1:
        wh_spec = cspec((TK, 21))                       # VMEM-resident
    else:
        wh_spec = pl.BlockSpec((TK, 21), lambda i, k: (k, 0))   # streamed over k

    in_specs = [
        pl.BlockSpec((TB, TK), lambda i, k: (i, k)),    # x, pipelined
        wh_spec,
        cspec((1, 21)),
        cspec((21, 128)),
        cspec((1, 128)),
        cspec((128, 64)),
        cspec((1, 64)),
        cspec((64, 128)),
        cspec((1, 128)),
    ]
    out_spec = pl.BlockSpec((TB, 128), lambda i, k: (i, 0))

    out = pl.pallas_call(
        _meta_kernel,
        out_shape=jax.ShapeDtypeStruct((B, 128), jnp.float32),
        grid=grid,
        in_specs=in_specs,
        out_specs=out_spec,
        scratch_shapes=[pltpu.VMEM((TB, 21), jnp.float32)],
        compiler_params=pltpu.CompilerParams(
            dimension_semantics=("parallel", "arbitrary"),
            vmem_limit_bytes=int(vmem_limit),
        ),
    )(x, fused["w_heads"], fused["b_heads"],
      fused["fc1_w"], fused["fc1_b"],
      fused["fc2_w"], fused["fc2_b"],
      fused["fc3_w"], fused["fc3_b"])

    return out[:, :7]


def make_params(key, D):
    ks = jax.random.split(key, 12)
    s = 0.05
    return {
        # stand-in base models: Linear(D, 7)
        "wA": jax.random.normal(ks[0], (D, 7), jnp.float32) * s,
        "bA": jax.random.normal(ks[1], (1, 7), jnp.float32) * s,
        "wB": jax.random.normal(ks[2], (D, 7), jnp.float32) * s,
        "bB": jax.random.normal(ks[3], (1, 7), jnp.float32) * s,
        "wC": jax.random.normal(ks[4], (D, 7), jnp.float32) * s,
        "bC": jax.random.normal(ks[5], (1, 7), jnp.float32) * s,
        # MetaLearner head: fc1(21,128), fc2(128,64), fc3(64,7)
        "fc1_w": jax.random.normal(ks[6], (21, 128), jnp.float32) * s,
        "fc1_b": jax.random.normal(ks[7], (1, 128), jnp.float32) * s,
        "fc2_w": jax.random.normal(ks[8], (128, 64), jnp.float32) * s,
        "fc2_b": jax.random.normal(ks[9], (1, 64), jnp.float32) * s,
        "fc3_w": jax.random.normal(ks[10], (64, 7), jnp.float32) * s,
        "fc3_b": jax.random.normal(ks[11], (1, 7), jnp.float32) * s,
    }


def reference_forward(x_nchw, params):
    """Plain-JAX f32 reference matching the PyTorch semantics."""
    B = x_nchw.shape[0]
    x = x_nchw.reshape(B, -1).astype(jnp.float32)
    p1 = jax.nn.softmax(x @ params["wA"] + params["bA"], axis=1)
    p2 = jax.nn.softmax(x @ params["wB"] + params["bB"], axis=1)
    p3 = jax.nn.softmax(x @ params["wC"] + params["bC"], axis=1)
    cat = jnp.concatenate([p1, p2, p3], axis=1)                 # (B, 21)
    h1 = jax.nn.relu(cat @ params["fc1_w"] + params["fc1_b"])
    h2 = jax.nn.relu(h1 @ params["fc2_w"] + params["fc2_b"])
    return h2 @ params["fc3_w"] + params["fc3_b"]


if __name__ == "__main__":
    key = jax.random.PRNGKey(0)
    kx, kp = jax.random.split(key)

    B, C, H, W = 2, 4, 16, 16
    D = C * H * W
    x = jax.random.normal(kx, (B, C, H, W), jnp.float32)
    params = make_params(kp, D)
    fused = prepare_params(params)      # hoisted one-time weight fusion

    fwd = jax.jit(functools.partial(meta_learner_forward,
                                    single_buffer_weights=True))
    try:
        out = jax.block_until_ready(fwd(x, fused))
    except Exception:
        # Fallback if this runtime rejects pipeline_mode=pl.Buffered(1).
        fwd = jax.jit(functools.partial(meta_learner_forward,
                                        single_buffer_weights=False))
        out = jax.block_until_ready(fwd(x, fused))

    ref = reference_forward(x, params)
    assert out.shape == (B, 7)
    # bf16 heads GEMM (f32 accumulation) + approx reciprocal -> relaxed tolerance.
    assert jnp.allclose(out, ref, atol=2e-2, rtol=2e-2), (out, ref)

    print("KERNEL_OK")
</pallas_src>

<mosaic_0001>
module attributes {stable_mosaic.version = 11 : i64} {
  func.func @_meta_kernel(%arg0: i32, %arg1: i32, %arg2: memref<8x1024xf32, #tpu.memory_space<vmem>>, %arg3: memref<1024x21xbf16, #tpu.memory_space<vmem>>, %arg4: memref<1x21xf32, #tpu.memory_space<vmem>>, %arg5: memref<21x128xf32, #tpu.memory_space<vmem>>, %arg6: memref<1x128xf32, #tpu.memory_space<vmem>>, %arg7: memref<128x64xf32, #tpu.memory_space<vmem>>, %arg8: memref<1x64xf32, #tpu.memory_space<vmem>>, %arg9: memref<64x128xf32, #tpu.memory_space<vmem>>, %arg10: memref<1x128xf32, #tpu.memory_space<vmem>>, %arg11: memref<8x128xf32, #tpu.memory_space<vmem>>, %arg12: memref<8x21xf32, #tpu.memory_space<vmem>>) attributes {dimension_semantics = [#tpu.dimension_semantics<parallel>, #tpu.dimension_semantics<arbitrary>], iteration_bounds = array<i64: 1, 1>, scalar_prefetch = 0 : i64, scratch_operands = 1 : i64, tpu.core_type = #tpu.core_type<tc>, window_params = [{transform_indices = @transform_0, window_bounds = array<i64: 8, 1024>}, {pipeline_mode = #tpu.pipeline_mode<synchronous>, transform_indices = @transform_1, window_bounds = array<i64: 1024, 21>}, {pipeline_mode = #tpu.pipeline_mode<synchronous>, transform_indices = @transform_2, window_bounds = array<i64: 1, 21>}, {pipeline_mode = #tpu.pipeline_mode<synchronous>, transform_indices = @transform_3, window_bounds = array<i64: 21, 128>}, {pipeline_mode = #tpu.pipeline_mode<synchronous>, transform_indices = @transform_4, window_bounds = array<i64: 1, 128>}, {pipeline_mode = #tpu.pipeline_mode<synchronous>, transform_indices = @transform_5, window_bounds = array<i64: 128, 64>}, {pipeline_mode = #tpu.pipeline_mode<synchronous>, transform_indices = @transform_6, window_bounds = array<i64: 1, 64>}, {pipeline_mode = #tpu.pipeline_mode<synchronous>, transform_indices = @transform_7, window_bounds = array<i64: 64, 128>}, {pipeline_mode = #tpu.pipeline_mode<synchronous>, transform_indices = @transform_8, window_bounds = array<i64: 1, 128>}, {transform_indices = @transform_9, window_bounds = array<i64: 8, 128>}]} {
    %c0_i32 = arith.constant 0 : i32
    %0 = arith.cmpi eq, %arg1, %c0_i32 : i32
    %1 = arith.extui %0 : i1 to i32
    %c0_i32_0 = arith.constant 0 : i32
    %2 = arith.cmpi ne, %1, %c0_i32_0 : i32
    scf.if %2 {
      %cst_10 = arith.constant 0.000000e+00 : f32
      %13 = vector.broadcast %cst_10 : f32 to vector<8x21xf32>
      %c0_11 = arith.constant 0 : index
      %c0_12 = arith.constant 0 : index
      %14 = vector.load %arg12[%c0_11, %c0_12] : memref<8x21xf32, #tpu.memory_space<vmem>>, vector<8x21xf32>
      tpu.vector_store %arg12[%c0_11, %c0_12], %13 {strides = array<i32>} : memref<8x21xf32, #tpu.memory_space<vmem>>, vector<8x21xf32>,
    } else {
    }
    %c0 = arith.constant 0 : index
    %c0_1 = arith.constant 0 : index
    %3 = vector.load %arg2[%c0, %c0_1] : memref<8x1024xf32, #tpu.memory_space<vmem>>, vector<8x1024xf32>
    %4 = arith.truncf %3 : vector<8x1024xf32> to vector<8x1024xbf16>
    %c0_2 = arith.constant 0 : index
    %c0_3 = arith.constant 0 : index
    %5 = vector.load %arg12[%c0_2, %c0_3] : memref<8x21xf32, #tpu.memory_space<vmem>>, vector<8x21xf32>
    %c0_4 = arith.constant 0 : index
    %c0_5 = arith.constant 0 : index
    %6 = vector.load %arg3[%c0_4, %c0_5] : memref<1024x21xbf16, #tpu.memory_space<vmem>>, vector<1024x21xbf16>
    %cst = arith.constant dense<0.000000e+00> : vector<8x21xf32>
    %7 = tpu.matmul %4, %6, %cst {dimension_numbers = #tpu.dot_dimension_numbers<[1], [0], [0], [1], [0, 0, 1, 1], [], []>} : vector<8x1024xbf16>, vector<1024x21xbf16>, vector<8x21xf32> -> vector<8x21xf32>
    %8 = arith.addf %5, %7 : vector<8x21xf32>
    %c0_6 = arith.constant 0 : index
    %c0_7 = arith.constant 0 : index
    %9 = vector.load %arg12[%c0_6, %c0_7] : memref<8x21xf32, #tpu.memory_space<vmem>>, vector<8x21xf32>
    tpu.vector_store %arg12[%c0_6, %c0_7], %8 {strides = array<i32>} : memref<8x21xf32, #tpu.memory_space<vmem>>, vector<8x21xf32>,
    %c0_i32_8 = arith.constant 0 : i32
    %10 = arith.cmpi eq, %arg1, %c0_i32_8 : i32
    %11 = arith.extui %10 : i1 to i32
    %c0_i32_9 = arith.constant 0 : i32
    %12 = arith.cmpi ne, %11, %c0_i32_9 : i32
    scf.if %12 {
      %c0_10 = arith.constant 0 : index
      %c0_11 = arith.constant 0 : index
      %13 = vector.load %arg12[%c0_10, %c0_11] : memref<8x21xf32, #tpu.memory_space<vmem>>, vector<8x21xf32>
      %c0_12 = arith.constant 0 : index
      %c0_13 = arith.constant 0 : index
      %14 = vector.load %arg4[%c0_12, %c0_13] : memref<1x21xf32, #tpu.memory_space<vmem>>, vector<1x21xf32>
      %15 = vector.broadcast %14 : vector<1x21xf32> to vector<8x21xf32>
      %16 = arith.addf %13, %15 : vector<8x21xf32>
      %17 = tpu.iota {dimensions = array<i32: 1>} : vector<8x21xi32>
      %c7_i32 = arith.constant 7 : i32
      %18 = vector.broadcast %c7_i32 : i32 to vector<8x21xi32>
      %19 = arith.cmpi slt, %17, %18 : vector<8x21xi32>
      %c7_i32_14 = arith.constant 7 : i32
      %20 = vector.broadcast %c7_i32_14 : i32 to vector<8x21xi32>
      %21 = arith.cmpi sge, %17, %20 : vector<8x21xi32>
      %c14_i32 = arith.constant 14 : i32
      %22 = vector.broadcast %c14_i32 : i32 to vector<8x21xi32>
      %23 = arith.cmpi slt, %17, %22 : vector<8x21xi32>
      %24 = arith.andi %21, %23 : vector<8x21xi1>
      %cst_15 = arith.constant 0xFF800000 : f32
      %25 = vector.broadcast %cst_15 : f32 to vector<8x21xf32>
      %26 = arith.select %19, %16, %25 : vector<8x21xi1>, vector<8x21xf32>
      %cst_16 = arith.constant dense<0xFF800000> : vector<8xf32>
      %27 = vector.multi_reduction <maximumf>, %26, %cst_16 [1] : vector<8x21xf32> to vector<8xf32>
      %28 = vector.shape_cast %27 : vector<8xf32> to vector<8x1xf32>
      %cst_17 = arith.constant 0xFF800000 : f32
      %29 = vector.broadcast %cst_17 : f32 to vector<8x21xf32>
      %30 = arith.select %24, %16, %29 : vector<8x21xi1>, vector<8x21xf32>
      %cst_18 = arith.constant dense<0xFF800000> : vector<8xf32>
      %31 = vector.multi_reduction <maximumf>, %30, %cst_18 [1] : vector<8x21xf32> to vector<8xf32>
      %32 = vector.shape_cast %31 : vector<8xf32> to vector<8x1xf32>
      %33 = arith.ori %19, %24 : vector<8x21xi1>
      %cst_19 = arith.constant 0xFF800000 : f32
      %34 = vector.broadcast %cst_19 : f32 to vector<8x21xf32>
      %35 = arith.select %33, %34, %16 : vector<8x21xi1>, vector<8x21xf32>
      %cst_20 = arith.constant dense<0xFF800000> : vector<8xf32>
      %36 = vector.multi_reduction <maximumf>, %35, %cst_20 [1] : vector<8x21xf32> to vector<8xf32>
      %37 = vector.shape_cast %36 : vector<8xf32> to vector<8x1xf32>
      %38 = vector.shape_cast %32 : vector<8x1xf32> to vector<8x1xf32>
      %39 = vector.broadcast %38 : vector<8x1xf32> to vector<8x21xf32>
      %40 = vector.shape_cast %37 : vector<8x1xf32> to vector<8x1xf32>
      %41 = vector.broadcast %40 : vector<8x1xf32> to vector<8x21xf32>
      %42 = arith.select %24, %39, %41 : vector<8x21xi1>, vector<8x21xf32>
      %43 = vector.shape_cast %28 : vector<8x1xf32> to vector<8x1xf32>
      %44 = vector.broadcast %43 : vector<8x1xf32> to vector<8x21xf32>
      %45 = arith.select %19, %44, %42 : vector<8x21xi1>, vector<8x21xf32>
      %46 = arith.subf %16, %45 : vector<8x21xf32>
      %47 = math.exp %46 : vector<8x21xf32>
      %cst_21 = arith.constant 0.000000e+00 : f32
      %48 = vector.broadcast %cst_21 : f32 to vector<8x21xf32>
      %49 = arith.select %19, %47, %48 : vector<8x21xi1>, vector<8x21xf32>
      %cst_22 = arith.constant dense<0.000000e+00> : vector<8xf32>
      %50 = vector.multi_reduction <add>, %49, %cst_22 [1] : vector<8x21xf32> to vector<8xf32>
      %51 = vector.shape_cast %50 : vector<8xf32> to vector<8x1xf32>
      %cst_23 = arith.constant 0.000000e+00 : f32
      %52 = vector.broadcast %cst_23 : f32 to vector<8x21xf32>
      %53 = arith.select %24, %47, %52 : vector<8x21xi1>, vector<8x21xf32>
      %cst_24 = arith.constant dense<0.000000e+00> : vector<8xf32>
      %54 = vector.multi_reduction <add>, %53, %cst_24 [1] : vector<8x21xf32> to vector<8xf32>
      %55 = vector.shape_cast %54 : vector<8xf32> to vector<8x1xf32>
      %56 = arith.ori %19, %24 : vector<8x21xi1>
      %cst_25 = arith.constant 0.000000e+00 : f32
      %57 = vector.broadcast %cst_25 : f32 to vector<8x21xf32>
      %58 = arith.select %56, %57, %47 : vector<8x21xi1>, vector<8x21xf32>
      %cst_26 = arith.constant dense<0.000000e+00> : vector<8xf32>
      %59 = vector.multi_reduction <add>, %58, %cst_26 [1] : vector<8x21xf32> to vector<8xf32>
      %60 = vector.shape_cast %59 : vector<8xf32> to vector<8x1xf32>
      %61 = vector.shape_cast %55 : vector<8x1xf32> to vector<8x1xf32>
      %62 = vector.broadcast %61 : vector<8x1xf32> to vector<8x21xf32>
      %63 = vector.shape_cast %60 : vector<8x1xf32> to vector<8x1xf32>
      %64 = vector.broadcast %63 : vector<8x1xf32> to vector<8x21xf32>
      %65 = arith.select %24, %62, %64 : vector<8x21xi1>, vector<8x21xf32>
      %66 = vector.shape_cast %51 : vector<8x1xf32> to vector<8x1xf32>
      %67 = vector.broadcast %66 : vector<8x1xf32> to vector<8x21xf32>
      %68 = arith.select %19, %67, %65 : vector<8x21xi1>, vector<8x21xf32>
      %69 = tpu.reciprocal %68 {approx = true} : vector<8x21xf32> -> vector<8x21xf32>
      %70 = arith.mulf %47, %69 : vector<8x21xf32>
      %c0_27 = arith.constant 0 : index
      %c0_28 = arith.constant 0 : index
      %71 = vector.load %arg5[%c0_27, %c0_28] : memref<21x128xf32, #tpu.memory_space<vmem>>, vector<21x128xf32>
      %cst_29 = arith.constant dense<0.000000e+00> : vector<8x128xf32>
      %72 = tpu.matmul %70, %71, %cst_29 {dimension_numbers = #tpu.dot_dimension_numbers<[1], [0], [0], [1], [0, 0, 1, 1], [], []>} : vector<8x21xf32>, vector<21x128xf32>, vector<8x128xf32> -> vector<8x128xf32>
      %c0_30 = arith.constant 0 : index
      %c0_31 = arith.constant 0 : index
      %73 = vector.load %arg6[%c0_30, %c0_31] : memref<1x128xf32, #tpu.memory_space<vmem>>, vector<1x128xf32>
      %74 = vector.broadcast %73 : vector<1x128xf32> to vector<8x128xf32>
      %75 = arith.addf %72, %74 : vector<8x128xf32>
      %cst_32 = arith.constant 0.000000e+00 : f32
      %76 = vector.broadcast %cst_32 : f32 to vector<8x128xf32>
      %77 = arith.maximumf %75, %76 : vector<8x128xf32>
      %c0_33 = arith.constant 0 : index
      %c0_34 = arith.constant 0 : index
      %78 = vector.load %arg7[%c0_33, %c0_34] : memref<128x64xf32, #tpu.memory_space<vmem>>, vector<128x64xf32>
      %cst_35 = arith.constant dense<0.000000e+00> : vector<8x64xf32>
      %79 = tpu.matmul %77, %78, %cst_35 {dimension_numbers = #tpu.dot_dimension_numbers<[1], [0], [0], [1], [0, 0, 1, 1], [], []>} : vector<8x128xf32>, vector<128x64xf32>, vector<8x64xf32> -> vector<8x64xf32>
      %c0_36 = arith.constant 0 : index
      %c0_37 = arith.constant 0 : index
      %80 = vector.load %arg8[%c0_36, %c0_37] : memref<1x64xf32, #tpu.memory_space<vmem>>, vector<1x64xf32>
      %81 = vector.broadcast %80 : vector<1x64xf32> to vector<8x64xf32>
      %82 = arith.addf %79, %81 : vector<8x64xf32>
      %cst_38 = arith.constant 0.000000e+00 : f32
      %83 = vector.broadcast %cst_38 : f32 to vector<8x64xf32>
      %84 = arith.maximumf %82, %83 : vector<8x64xf32>
      %c0_39 = arith.constant 0 : index
      %c0_40 = arith.constant 0 : index
      %85 = vector.load %arg9[%c0_39, %c0_40] : memref<64x128xf32, #tpu.memory_space<vmem>>, vector<64x128xf32>
      %cst_41 = arith.constant dense<0.000000e+00> : vector<8x128xf32>
      %86 = tpu.matmul %84, %85, %cst_41 {dimension_numbers = #tpu.dot_dimension_numbers<[1], [0], [0], [1], [0, 0, 1, 1], [], []>} : vector<8x64xf32>, vector<64x128xf32>, vector<8x128xf32> -> vector<8x128xf32>
      %c0_42 = arith.constant 0 : index
      %c0_43 = arith.constant 0 : index
      %87 = vector.load %arg10[%c0_42, %c0_43] : memref<1x128xf32, #tpu.memory_space<vmem>>, vector<1x128xf32>
      %88 = vector.broadcast %87 : vector<1x128xf32> to vector<8x128xf32>
      %89 = arith.addf %86, %88 : vector<8x128xf32>
      %c0_44 = arith.constant 0 : index
      %c0_45 = arith.constant 0 : index
      %90 = vector.load %arg11[%c0_44, %c0_45] : memref<8x128xf32, #tpu.memory_space<vmem>>, vector<8x128xf32>
      tpu.vector_store %arg11[%c0_44, %c0_45], %89 {strides = array<i32>} : memref<8x128xf32, #tpu.memory_space<vmem>>, vector<8x128xf32>,
    } else {
    }
    return
  }
  func.func @transform_0(%arg0: i32, %arg1: i32) -> (i32, i32) {
    %c0_i32 = arith.constant 0 : i32
    return %arg0, %arg1 : i32, i32
  }
  func.func @transform_1(%arg0: i32, %arg1: i32) -> (i32, i32) {
    %c0_i32 = arith.constant 0 : i32
    %c0_i32_0 = arith.constant 0 : i32
    %c0_i32_1 = arith.constant 0 : i32
    return %c0_i32, %c0_i32_0 : i32, i32
  }
  func.func @transform_2(%arg0: i32, %arg1: i32) -> (i32, i32) {
    %c0_i32 = arith.constant 0 : i32
    %c0_i32_0 = arith.constant 0 : i32
    %c0_i32_1 = arith.constant 0 : i32
    return %c0_i32, %c0_i32_0 : i32, i32
  }
  func.func @transform_3(%arg0: i32, %arg1: i32) -> (i32, i32) {
    %c0_i32 = arith.constant 0 : i32
    %c0_i32_0 = arith.constant 0 : i32
    %c0_i32_1 = arith.constant 0 : i32
    return %c0_i32, %c0_i32_0 : i32, i32
  }
  func.func @transform_4(%arg0: i32, %arg1: i32) -> (i32, i32) {
    %c0_i32 = arith.constant 0 : i32
    %c0_i32_0 = arith.constant 0 : i32
    %c0_i32_1 = arith.constant 0 : i32
    return %c0_i32, %c0_i32_0 : i32, i32
  }
  func.func @transform_5(%arg0: i32, %arg1: i32) -> (i32, i32) {
    %c0_i32 = arith.constant 0 : i32
    %c0_i32_0 = arith.constant 0 : i32
    %c0_i32_1 = arith.constant 0 : i32
    return %c0_i32, %c0_i32_0 : i32, i32
  }
  func.func @transform_6(%arg0: i32, %arg1: i32) -> (i32, i32) {
    %c0_i32 = arith.constant 0 : i32
    %c0_i32_0 = arith.constant 0 : i32
    %c0_i32_1 = arith.constant 0 : i32
    return %c0_i32, %c0_i32_0 : i32, i32
  }
  func.func @transform_7(%arg0: i32, %arg1: i32) -> (i32, i32) {
    %c0_i32 = arith.constant 0 : i32
    %c0_i32_0 = arith.constant 0 : i32
    %c0_i32_1 = arith.constant 0 : i32
    return %c0_i32, %c0_i32_0 : i32, i32
  }
  func.func @transform_8(%arg0: i32, %arg1: i32) -> (i32, i32) {
    %c0_i32 = arith.constant 0 : i32
    %c0_i32_0 = arith.constant 0 : i32
    %c0_i32_1 = arith.constant 0 : i32
    return %c0_i32, %c0_i32_0 : i32, i32
  }
  func.func @transform_9(%arg0: i32, %arg1: i32) -> (i32, i32) {
    %c0_i32 = arith.constant 0 : i32
    %c0_i32_0 = arith.constant 0 : i32
    return %arg0, %c0_i32 : i32, i32
  }
}

module attributes {stable_mosaic.version = 11 : i64} {
  func.func @_meta_kernel(%arg0: i32, %arg1: i32, %arg2: memref<8x1024xf32, #tpu.memory_space<vmem>>, %arg3: memref<1024x21xbf16, #tpu.memory_space<vmem>>, %arg4: memref<1x21xf32, #tpu.memory_space<vmem>>, %arg5: memref<21x128xf32, #tpu.memory_space<vmem>>, %arg6: memref<1x128xf32, #tpu.memory_space<vmem>>, %arg7: memref<128x64xf32, #tpu.memory_space<vmem>>, %arg8: memref<1x64xf32, #tpu.memory_space<vmem>>, %arg9: memref<64x128xf32, #tpu.memory_space<vmem>>, %arg10: memref<1x128xf32, #tpu.memory_space<vmem>>, %arg11: memref<8x128xf32, #tpu.memory_space<vmem>>, %arg12: memref<8x21xf32, #tpu.memory_space<vmem>>) attributes {dimension_semantics = [#tpu.dimension_semantics<parallel>, #tpu.dimension_semantics<arbitrary>], iteration_bounds = array<i64: 1, 1>, scalar_prefetch = 0 : i64, scratch_operands = 1 : i64, tpu.core_type = #tpu.core_type<tc>, window_params = [{transform_indices = @transform_0, window_bounds = array<i64: 8, 1024>}, {pipeline_mode = #tpu.pipeline_mode<synchronous>, transform_indices = @transform_1, window_bounds = array<i64: 1024, 21>}, {pipeline_mode = #tpu.pipeline_mode<synchronous>, transform_indices = @transform_2, window_bounds = array<i64: 1, 21>}, {pipeline_mode = #tpu.pipeline_mode<synchronous>, transform_indices = @transform_3, window_bounds = array<i64: 21, 128>}, {pipeline_mode = #tpu.pipeline_mode<synchronous>, transform_indices = @transform_4, window_bounds = array<i64: 1, 128>}, {pipeline_mode = #tpu.pipeline_mode<synchronous>, transform_indices = @transform_5, window_bounds = array<i64: 128, 64>}, {pipeline_mode = #tpu.pipeline_mode<synchronous>, transform_indices = @transform_6, window_bounds = array<i64: 1, 64>}, {pipeline_mode = #tpu.pipeline_mode<synchronous>, transform_indices = @transform_7, window_bounds = array<i64: 64, 128>}, {pipeline_mode = #tpu.pipeline_mode<synchronous>, transform_indices = @transform_8, window_bounds = array<i64: 1, 128>}, {transform_indices = @transform_9, window_bounds = array<i64: 8, 128>}]} {
    %c0_i32 = arith.constant 0 : i32
    %0 = arith.cmpi eq, %arg1, %c0_i32 : i32
    %1 = arith.extui %0 : i1 to i32
    %c0_i32_0 = arith.constant 0 : i32
    %2 = arith.cmpi ne, %1, %c0_i32_0 : i32
    scf.if %2 {
      %cst_10 = arith.constant 0.000000e+00 : f32
      %13 = vector.broadcast %cst_10 : f32 to vector<8x21xf32>
      %c0_11 = arith.constant 0 : index
      %c0_12 = arith.constant 0 : index
      %14 = vector.load %arg12[%c0_11, %c0_12] : memref<8x21xf32, #tpu.memory_space<vmem>>, vector<8x21xf32>
      tpu.vector_store %arg12[%c0_11, %c0_12], %13 {strides = array<i32>} : memref<8x21xf32, #tpu.memory_space<vmem>>, vector<8x21xf32>,
    } else {
    }
    %c0 = arith.constant 0 : index
    %c0_1 = arith.constant 0 : index
    %3 = vector.load %arg2[%c0, %c0_1] : memref<8x1024xf32, #tpu.memory_space<vmem>>, vector<8x1024xf32>
    %4 = arith.truncf %3 : vector<8x1024xf32> to vector<8x1024xbf16>
    %c0_2 = arith.constant 0 : index
    %c0_3 = arith.constant 0 : index
    %5 = vector.load %arg12[%c0_2, %c0_3] : memref<8x21xf32, #tpu.memory_space<vmem>>, vector<8x21xf32>
    %c0_4 = arith.constant 0 : index
    %c0_5 = arith.constant 0 : index
    %6 = vector.load %arg3[%c0_4, %c0_5] : memref<1024x21xbf16, #tpu.memory_space<vmem>>, vector<1024x21xbf16>
    %cst = arith.constant dense<0.000000e+00> : vector<8x21xf32>
    %7 = tpu.matmul %4, %6, %cst {dimension_numbers = #tpu.dot_dimension_numbers<[1], [0], [0], [1], [0, 0, 1, 1], [], []>} : vector<8x1024xbf16>, vector<1024x21xbf16>, vector<8x21xf32> -> vector<8x21xf32>
    %8 = arith.addf %5, %7 : vector<8x21xf32>
    %c0_6 = arith.constant 0 : index
    %c0_7 = arith.constant 0 : index
    %9 = vector.load %arg12[%c0_6, %c0_7] : memref<8x21xf32, #tpu.memory_space<vmem>>, vector<8x21xf32>
    tpu.vector_store %arg12[%c0_6, %c0_7], %8 {strides = array<i32>} : memref<8x21xf32, #tpu.memory_space<vmem>>, vector<8x21xf32>,
    %c0_i32_8 = arith.constant 0 : i32
    %10 = arith.cmpi eq, %arg1, %c0_i32_8 : i32
    %11 = arith.extui %10 : i1 to i32
    %c0_i32_9 = arith.constant 0 : i32
    %12 = arith.cmpi ne, %11, %c0_i32_9 : i32
    scf.if %12 {
      %c0_10 = arith.constant 0 : index
      %c0_11 = arith.constant 0 : index
      %13 = vector.load %arg12[%c0_10, %c0_11] : memref<8x21xf32, #tpu.memory_space<vmem>>, vector<8x21xf32>
      %c0_12 = arith.constant 0 : index
      %c0_13 = arith.constant 0 : index
      %14 = vector.load %arg4[%c0_12, %c0_13] : memref<1x21xf32, #tpu.memory_space<vmem>>, vector<1x21xf32>
      %15 = vector.broadcast %14 : vector<1x21xf32> to vector<8x21xf32>
      %16 = arith.addf %13, %15 : vector<8x21xf32>
      %17 = tpu.iota {dimensions = array<i32: 1>} : vector<8x21xi32>
      %c7_i32 = arith.constant 7 : i32
      %18 = vector.broadcast %c7_i32 : i32 to vector<8x21xi32>
      %19 = arith.cmpi slt, %17, %18 : vector<8x21xi32>
      %c7_i32_14 = arith.constant 7 : i32
      %20 = vector.broadcast %c7_i32_14 : i32 to vector<8x21xi32>
      %21 = arith.cmpi sge, %17, %20 : vector<8x21xi32>
      %c14_i32 = arith.constant 14 : i32
      %22 = vector.broadcast %c14_i32 : i32 to vector<8x21xi32>
      %23 = arith.cmpi slt, %17, %22 : vector<8x21xi32>
      %24 = arith.andi %21, %23 : vector<8x21xi1>
      %cst_15 = arith.constant 0xFF800000 : f32
      %25 = vector.broadcast %cst_15 : f32 to vector<8x21xf32>
      %26 = arith.select %19, %16, %25 : vector<8x21xi1>, vector<8x21xf32>
      %cst_16 = arith.constant dense<0xFF800000> : vector<8xf32>
      %27 = vector.multi_reduction <maximumf>, %26, %cst_16 [1] : vector<8x21xf32> to vector<8xf32>
      %28 = vector.shape_cast %27 : vector<8xf32> to vector<8x1xf32>
      %cst_17 = arith.constant 0xFF800000 : f32
      %29 = vector.broadcast %cst_17 : f32 to vector<8x21xf32>
      %30 = arith.select %24, %16, %29 : vector<8x21xi1>, vector<8x21xf32>
      %cst_18 = arith.constant dense<0xFF800000> : vector<8xf32>
      %31 = vector.multi_reduction <maximumf>, %30, %cst_18 [1] : vector<8x21xf32> to vector<8xf32>
      %32 = vector.shape_cast %31 : vector<8xf32> to vector<8x1xf32>
      %33 = arith.ori %19, %24 : vector<8x21xi1>
      %cst_19 = arith.constant 0xFF800000 : f32
      %34 = vector.broadcast %cst_19 : f32 to vector<8x21xf32>
      %35 = arith.select %33, %34, %16 : vector<8x21xi1>, vector<8x21xf32>
      %cst_20 = arith.constant dense<0xFF800000> : vector<8xf32>
      %36 = vector.multi_reduction <maximumf>, %35, %cst_20 [1] : vector<8x21xf32> to vector<8xf32>
      %37 = vector.shape_cast %36 : vector<8xf32> to vector<8x1xf32>
      %38 = vector.shape_cast %32 : vector<8x1xf32> to vector<8x1xf32>
      %39 = vector.broadcast %38 : vector<8x1xf32> to vector<8x21xf32>
      %40 = vector.shape_cast %37 : vector<8x1xf32> to vector<8x1xf32>
      %41 = vector.broadcast %40 : vector<8x1xf32> to vector<8x21xf32>
      %42 = arith.select %24, %39, %41 : vector<8x21xi1>, vector<8x21xf32>
      %43 = vector.shape_cast %28 : vector<8x1xf32> to vector<8x1xf32>
      %44 = vector.broadcast %43 : vector<8x1xf32> to vector<8x21xf32>
      %45 = arith.select %19, %44, %42 : vector<8x21xi1>, vector<8x21xf32>
      %46 = arith.subf %16, %45 : vector<8x21xf32>
      %47 = math.exp %46 : vector<8x21xf32>
      %cst_21 = arith.constant 0.000000e+00 : f32
      %48 = vector.broadcast %cst_21 : f32 to vector<8x21xf32>
      %49 = arith.select %19, %47, %48 : vector<8x21xi1>, vector<8x21xf32>
      %cst_22 = arith.constant dense<0.000000e+00> : vector<8xf32>
      %50 = vector.multi_reduction <add>, %49, %cst_22 [1] : vector<8x21xf32> to vector<8xf32>
      %51 = vector.shape_cast %50 : vector<8xf32> to vector<8x1xf32>
      %cst_23 = arith.constant 0.000000e+00 : f32
      %52 = vector.broadcast %cst_23 : f32 to vector<8x21xf32>
      %53 = arith.select %24, %47, %52 : vector<8x21xi1>, vector<8x21xf32>
      %cst_24 = arith.constant dense<0.000000e+00> : vector<8xf32>
      %54 = vector.multi_reduction <add>, %53, %cst_24 [1] : vector<8x21xf32> to vector<8xf32>
      %55 = vector.shape_cast %54 : vector<8xf32> to vector<8x1xf32>
      %56 = arith.ori %19, %24 : vector<8x21xi1>
      %cst_25 = arith.constant 0.000000e+00 : f32
      %57 = vector.broadcast %cst_25 : f32 to vector<8x21xf32>
      %58 = arith.select %56, %57, %47 : vector<8x21xi1>, vector<8x21xf32>
      %cst_26 = arith.constant dense<0.000000e+00> : vector<8xf32>
      %59 = vector.multi_reduction <add>, %58, %cst_26 [1] : vector<8x21xf32> to vector<8xf32>
      %60 = vector.shape_cast %59 : vector<8xf32> to vector<8x1xf32>
      %61 = vector.shape_cast %55 : vector<8x1xf32> to vector<8x1xf32>
      %62 = vector.broadcast %61 : vector<8x1xf32> to vector<8x21xf32>
      %63 = vector.shape_cast %60 : vector<8x1xf32> to vector<8x1xf32>
      %64 = vector.broadcast %63 : vector<8x1xf32> to vector<8x21xf32>
      %65 = arith.select %24, %62, %64 : vector<8x21xi1>, vector<8x21xf32>
      %66 = vector.shape_cast %51 : vector<8x1xf32> to vector<8x1xf32>
      %67 = vector.broadcast %66 : vector<8x1xf32> to vector<8x21xf32>
      %68 = arith.select %19, %67, %65 : vector<8x21xi1>, vector<8x21xf32>
      %69 = tpu.reciprocal %68 {approx = true} : vector<8x21xf32> -> vector<8x21xf32>
      %70 = arith.mulf %47, %69 : vector<8x21xf32>
      %c0_27 = arith.constant 0 : index
      %c0_28 = arith.constant 0 : index
      %71 = vector.load %arg5[%c0_27, %c0_28] : memref<21x128xf32, #tpu.memory_space<vmem>>, vector<21x128xf32>
      %cst_29 = arith.constant dense<0.000000e+00> : vector<8x128xf32>
      %72 = tpu.matmul %70, %71, %cst_29 {dimension_numbers = #tpu.dot_dimension_numbers<[1], [0], [0], [1], [0, 0, 1, 1], [], []>} : vector<8x21xf32>, vector<21x128xf32>, vector<8x128xf32> -> vector<8x128xf32>
      %c0_30 = arith.constant 0 : index
      %c0_31 = arith.constant 0 : index
      %73 = vector.load %arg6[%c0_30, %c0_31] : memref<1x128xf32, #tpu.memory_space<vmem>>, vector<1x128xf32>
      %74 = vector.broadcast %73 : vector<1x128xf32> to vector<8x128xf32>
      %75 = arith.addf %72, %74 : vector<8x128xf32>
      %cst_32 = arith.constant 0.000000e+00 : f32
      %76 = vector.broadcast %cst_32 : f32 to vector<8x128xf32>
      %77 = arith.maximumf %75, %76 : vector<8x128xf32>
      %c0_33 = arith.constant 0 : index
      %c0_34 = arith.constant 0 : index
      %78 = vector.load %arg7[%c0_33, %c0_34] : memref<128x64xf32, #tpu.memory_space<vmem>>, vector<128x64xf32>
      %cst_35 = arith.constant dense<0.000000e+00> : vector<8x64xf32>
      %79 = tpu.matmul %77, %78, %cst_35 {dimension_numbers = #tpu.dot_dimension_numbers<[1], [0], [0], [1], [0, 0, 1, 1], [], []>} : vector<8x128xf32>, vector<128x64xf32>, vector<8x64xf32> -> vector<8x64xf32>
      %c0_36 = arith.constant 0 : index
      %c0_37 = arith.constant 0 : index
      %80 = vector.load %arg8[%c0_36, %c0_37] : memref<1x64xf32, #tpu.memory_space<vmem>>, vector<1x64xf32>
      %81 = vector.broadcast %80 : vector<1x64xf32> to vector<8x64xf32>
      %82 = arith.addf %79, %81 : vector<8x64xf32>
      %cst_38 = arith.constant 0.000000e+00 : f32
      %83 = vector.broadcast %cst_38 : f32 to vector<8x64xf32>
      %84 = arith.maximumf %82, %83 : vector<8x64xf32>
      %c0_39 = arith.constant 0 : index
      %c0_40 = arith.constant 0 : index
      %85 = vector.load %arg9[%c0_39, %c0_40] : memref<64x128xf32, #tpu.memory_space<vmem>>, vector<64x128xf32>
      %cst_41 = arith.constant dense<0.000000e+00> : vector<8x128xf32>
      %86 = tpu.matmul %84, %85, %cst_41 {dimension_numbers = #tpu.dot_dimension_numbers<[1], [0], [0], [1], [0, 0, 1, 1], [], []>} : vector<8x64xf32>, vector<64x128xf32>, vector<8x128xf32> -> vector<8x128xf32>
      %c0_42 = arith.constant 0 : index
      %c0_43 = arith.constant 0 : index
      %87 = vector.load %arg10[%c0_42, %c0_43] : memref<1x128xf32, #tpu.memory_space<vmem>>, vector<1x128xf32>
      %88 = vector.broadcast %87 : vector<1x128xf32> to vector<8x128xf32>
      %89 = arith.addf %86, %88 : vector<8x128xf32>
      %c0_44 = arith.constant 0 : index
      %c0_45 = arith.constant 0 : index
      %90 = vector.load %arg11[%c0_44, %c0_45] : memref<8x128xf32, #tpu.memory_space<vmem>>, vector<8x128xf32>
      tpu.vector_store %arg11[%c0_44, %c0_45], %89 {strides = array<i32>} : memref<8x128xf32, #tpu.memory_space<vmem>>, vector<8x128xf32>,
    } else {
    }
    return
  }
  func.func @transform_0(%arg0: i32, %arg1: i32) -> (i32, i32) {
    %c0_i32 = arith.constant 0 : i32
    return %arg0, %arg1 : i32, i32
  }
  func.func @transform_1(%arg0: i32, %arg1: i32) -> (i32, i32) {
    %c0_i32 = arith.constant 0 : i32
    %c0_i32_0 = arith.constant 0 : i32
    %c0_i32_1 = arith.constant 0 : i32
    return %c0_i32, %c0_i32_0 : i32, i32
  }
  func.func @transform_2(%arg0: i32, %arg1: i32) -> (i32, i32) {
    %c0_i32 = arith.constant 0 : i32
    %c0_i32_0 = arith.constant 0 : i32
    %c0_i32_1 = arith.constant 0 : i32
    return %c0_i32, %c0_i32_0 : i32, i32
  }
  func.func @transform_3(%arg0: i32, %arg1: i32) -> (i32, i32) {
    %c0_i32 = arith.constant 0 : i32
    %c0_i32_0 = arith.constant 0 : i32
    %c0_i32_1 = arith.constant 0 : i32
    return %c0_i32, %c0_i32_0 : i32, i32
  }
  func.func @transform_4(%arg0: i32, %arg1: i32) -> (i32, i32) {
    %c0_i32 = arith.constant 0 : i32
    %c0_i32_0 = arith.constant 0 : i32
    %c0_i32_1 = arith.constant 0 : i32
    return %c0_i32, %c0_i32_0 : i32, i32
  }
  func.func @transform_5(%arg0: i32, %arg1: i32) -> (i32, i32) {
    %c0_i32 = arith.constant 0 : i32
    %c0_i32_0 = arith.constant 0 : i32
    %c0_i32_1 = arith.constant 0 : i32
    return %c0_i32, %c0_i32_0 : i32, i32
  }
  func.func @transform_6(%arg0: i32, %arg1: i32) -> (i32, i32) {
    %c0_i32 = arith.constant 0 : i32
    %c0_i32_0 = arith.constant 0 : i32
    %c0_i32_1 = arith.constant 0 : i32
    return %c0_i32, %c0_i32_0 : i32, i32
  }
  func.func @transform_7(%arg0: i32, %arg1: i32) -> (i32, i32) {
    %c0_i32 = arith.constant 0 : i32
    %c0_i32_0 = arith.constant 0 : i32
    %c0_i32_1 = arith.constant 0 : i32
    return %c0_i32, %c0_i32_0 : i32, i32
  }
  func.func @transform_8(%arg0: i32, %arg1: i32) -> (i32, i32) {
    %c0_i32 = arith.constant 0 : i32
    %c0_i32_0 = arith.constant 0 : i32
    %c0_i32_1 = arith.constant 0 : i32
    return %c0_i32, %c0_i32_0 : i32, i32
  }
  func.func @transform_9(%arg0: i32, %arg1: i32) -> (i32, i32) {
    %c0_i32 = arith.constant 0 : i32
    %c0_i32_0 = arith.constant 0 : i32
    return %arg0, %c0_i32 : i32, i32
  }
}

</mosaic_0001>

<bundles_post_ra>
// kernel: meta_learner_forward.1
= control target key start
LH: loop header
LB: loop body
LE: loop exit
PB: predicated region body
PF: predicated region fallthrough
CT: control target
= control target key end

     0   :  { %14 = vsyncpa [#allocation4], 0  ;;  %v63_v29 = vlaneseq  ;;  %v1520_v34 = vmov 1983009808   ;;  %vm38_vm0 = vcmask 171008   ;;  %vm885_vm6 = vcmask 1044480   ;;  %s1986_s0 = inlined_call_operand.vmem [shape: f32[2,1024], index: 0, kind: input, shape index: {}]   ;;  %s1987_s1 = inlined_call_operand.vmem [shape: bf16[1024,21], index: 1, kind: input, shape index: {}]   ;;  %s1988_s2 = inlined_call_operand.vmem [shape: f32[1,21], index: 2, kind: input, shape index: {}]   ;;  %s1989_s3 = inlined_call_operand.vmem [shape: f32[21,128], index: 3, kind: input, shape index: {}]   ;;  %s1990_s4 = inlined_call_operand.vmem [shape: f32[1,128], index: 4, kind: input, shape index: {}]   ;;  %s1991_s5 = inlined_call_operand.vmem [shape: f32[128,64], index: 5, kind: input, shape index: {}]   ;;  %s1992_s6 = inlined_call_operand.vmem [shape: f32[1,64], index: 6, kind: input, shape index: {}]   ;;  %s1993_s7 = inlined_call_operand.vmem [shape: f32[64,128], index: 7, kind: input, shape index: {}]   ;;  %s1994_s8 = inlined_call_operand.vmem [shape: f32[1,128], index: 8, kind: input, shape index: {}]   ;;  %s1995_s9 = inlined_call_operand.hbm [shape: f32[2,128], index: 9, kind: output, shape index: {}]  }
   0x1   :  { %v1418_v0 = vld [vmem:[%s1987_s1 + $0x78] sm:$0xff]   ;;  %v1422_v4 = vld [vmem:[%s1987_s1 + $0x70] sm:$0xff]   ;;  %v1426_v8 = vld [vmem:[%s1987_s1 + $0x68] sm:$0xff]   ;;  %v61_v35 = vunpack.c.l.s4 %v1520_v34  ;;  %vm1522_vm7 = vmmov 0   ;;  %vm1069_vm8 = vcmask 523264  }
   0x2   :  { %v1419_v1 = vld [vmem:[%s1987_s1 + $0xf8] sm:$0xff]   ;;  %1231 = vmatprep.subr.bf16.mxu0 %v1418_v0  ;;  %v1423_v5 = vld [vmem:[%s1987_s1 + $0xf0] sm:$0xff]   ;;  %v1427_v9 = vld [vmem:[%s1987_s1 + $0xe8] sm:$0xff]   ;;  %v64_v36 = vshrl.u32 %v63_v29, 7 }
   0x3   :  { %v1420_v2 = vld [vmem:[%s1987_s1 + $0x38] sm:$0xff]   ;;  %1253 = vmatprep.subr.bf16.mxu1 %v1419_v1  ;;  %v1424_v6 = vld [vmem:[%s1987_s1 + $0x30] sm:$0xff]   ;;  %v1428_v10 = vld [vmem:[%s1987_s1 + $0x28] sm:$0xff]   ;;  %v62_v40 = vunpack.c.0.s8 %v61_v35 }
   0x4   :  { %v1421_v3 = vld [vmem:[%s1987_s1 + $0xb8] sm:$0xff]   ;;  %1232 = vmatpush3.bf16.msra.mxu0 %v1420_v2  ;;  %v1425_v7 = vld [vmem:[%s1987_s1 + $0xb0] sm:$0xff]   ;;  %v1429_v11 = vld [vmem:[%s1987_s1 + $0xa8] sm:$0xff]  }
   0x5   :  { %1254 = vmatpush3.bf16.msra.mxu1 %v1421_v3  ;;  %1233 = vmatprep.subr.bf16.mxu0 %v1422_v4  ;;  %v1430_v12 = vld [vmem:[%s1987_s1 + $0x60] sm:$0xff]   ;;  %v1434_v16 = vld [vmem:[%s1987_s1 + $0x58] sm:$0xff]   ;;  %v1438_v20 = vld [vmem:[%s1987_s1 + $0x50] sm:$0xff]   ;;  %v1691_v43 = vsub.s32 %v62_v40, %v64_v36 }
   0x6   :  { %1255 = vmatprep.subr.bf16.mxu1 %v1423_v5  ;;  %v1431_v13 = vld [vmem:[%s1987_s1 + $0xe0] sm:$0xff]   ;;  %v1435_v17 = vld [vmem:[%s1987_s1 + $0xd8] sm:$0xff]   ;;  %v1439_v21 = vld [vmem:[%s1987_s1 + $0xd0] sm:$0xff]  }
   0x7   :  { %v1432_v14 = vld [vmem:[%s1987_s1 + $0x20] sm:$0xff]   ;;  %v1436_v18 = vld [vmem:[%s1987_s1 + $0x18] sm:$0xff]   ;;  %v1440_v22 = vld [vmem:[%s1987_s1 + $0x10] sm:$0xff]  }
   0x8   :  { %1234 = vmatpush3.bf16.msra.mxu0 %v1424_v6  ;;  %v1433_v15 = vld [vmem:[%s1987_s1 + $0xa0] sm:$0xff]   ;;  %v1437_v19 = vld [vmem:[%s1987_s1 + $0x98] sm:$0xff]   ;;  %v1441_v23 = vld [vmem:[%s1987_s1 + $0x90] sm:$0xff]  }
   0x9   :  { %1256 = vmatpush3.bf16.msra.mxu1 %v1425_v7  ;;  %1235 = vmatprep.subr.bf16.mxu0 %v1426_v8  ;;  %v1442_v24 = vld [vmem:[%s1987_s1 + $0x48] sm:$0xff]   ;;  %v1446_v28 = vld [vmem:[%s1987_s1 + $0x40] sm:$0xff]   ;;  %v1456_v41 = vld [vmem:[%s1987_s1 + $0x178] sm:$0xff]  }
   0xa   :  { %1257 = vmatprep.subr.bf16.mxu1 %v1427_v9  ;;  %v1443_v25 = vld [vmem:[%s1987_s1 + $0xc8] sm:$0xff]   ;;  %v1447_v30 = vld [vmem:[%s1987_s1 + $0xc0] sm:$0xff]   ;;  %v1457_v42 = vld [vmem:[%s1987_s1 + $0x1f8] sm:$0xff]  }
   0xb   :  { %v1444_v26 = vld [vmem:[%s1987_s1 + $0x8] sm:$0xff]   ;;  %v1448_v31 = vld [vmem:[%s1987_s1] sm:$0xff]   ;;  %v1458_v52 = vld [vmem:[%s1987_s1 + $0x138] sm:$0xff]  }
   0xc   :  { %1236 = vmatpush3.bf16.msra.mxu0 %v1428_v10  ;;  %v1445_v27 = vld [vmem:[%s1987_s1 + $0x88] sm:$0xff]   ;;  %v1449_v32 = vld [vmem:[%s1987_s1 + $0x80] sm:$0xff]   ;;  %v1459_v53 = vld [vmem:[%s1987_s1 + $0x1b8] sm:$0xff]  }
   0xd   :  { %1258 = vmatpush3.bf16.msra.mxu1 %v1429_v11  ;;  %1237 = vmatprep.subr.bf16.mxu0 %v1430_v12  ;;  %v1450_v33 = vld [vmem:[%s1986_s0] ss:$16 sps:$4 sm:$0xff]   ;;  %v1454_v38 = vld [vmem:[%s1986_s0 + $0x4] ss:$16 sps:$4 sm:$0xff]   ;;  %v1464_v62 = vld [vmem:[%s1987_s1 + $0x168] sm:$0xff]  }
   0xe   :  { %1259 = vmatprep.subr.bf16.mxu1 %v1431_v13  ;;  %v1452_v37 = vld [vmem:[%s1986_s0 + $0x20] ss:$16 sps:$4 sm:$0xff]   ;;  %v1455_v39 = vld [vmem:[%s1986_s0 + $0x24] ss:$16 sps:$4 sm:$0xff]   ;;  %v66_v44 = vrot.slane %v1450_v33, %v1691_v43  ;;  %v73_v46 = vrot.slane %v1454_v38, %v1691_v43  ;;  %v1465_v63 = vld [vmem:[%s1987_s1 + $0x1e8] sm:$0xff]  }
   0xf   :  { %v80_v45 = vrot.slane %v1452_v37, %v1691_v43  ;;  %v87_v47 = vrot.slane %v1455_v39, %v1691_v43  ;;  %v1460_v58 = vld [vmem:[%s1987_s1 + $0x170] sm:$0xff]   ;;  %v1466_v0 = vld [vmem:[%s1987_s1 + $0x128] sm:$0xff]   ;;  %v1468_v2 = vld [vmem:[%s1987_s1 + $0x160] sm:$0xff]   ;;  %v1521_v39 = vmov 0.0  }
  0x10   :  { %1238 = vmatpush3.bf16.msra.mxu0 %v1432_v14  ;;  %v1461_v59 = vld [vmem:[%s1987_s1 + $0x1f0] sm:$0xff]   ;;  %v1467_v1 = vld [vmem:[%s1987_s1 + $0x1a8] sm:$0xff]   ;;  %v1469_v3 = vld [vmem:[%s1987_s1 + $0x1e0] sm:$0xff]   ;;  %39 = vst.msk [vmem:[#allocation2] sm:$0xff] %vm38_vm0, %v1521_v39 }
  0x11   :  { %1260 = vmatpush3.bf16.msra.mxu1 %v1433_v15  ;;  %1239 = vmatprep.subr.bf16.mxu0 %v1434_v16  ;;  %v89_v48 = vcombine.high %v66_v44, %v80_v45  ;;  %v91_v49 = vcombine.high %v73_v46, %v87_v47  ;;  %v88_v50 = vcombine.low %v66_v44, %v80_v45  ;;  %v1462_v60 = vld [vmem:[%s1987_s1 + $0x130] sm:$0xff]   ;;  %v1470_v4 = vld [vmem:[%s1987_s1 + $0x120] sm:$0xff]   ;;  %v1472_v6 = vld [vmem:[%s1987_s1 + $0x158] sm:$0xff]  }
  0x12   :  { %1261 = vmatprep.subr.bf16.mxu1 %v1435_v17  ;;  %v90_v51 = vcombine.low %v73_v46, %v87_v47  ;;  %v1463_v61 = vld [vmem:[%s1987_s1 + $0x1b0] sm:$0xff]   ;;  %v1471_v5 = vld [vmem:[%s1987_s1 + $0x1a0] sm:$0xff]   ;;  %v1473_v7 = vld [vmem:[%s1987_s1 + $0x1d8] sm:$0xff]  }
  0x13   :  { %v137_v54 = vpack.c.bf16 %v89_v48, %v89_v48  ;;  %v139_v55 = vpack.c.bf16 %v91_v49, %v91_v49  ;;  %v136_v56 = vpack.c.bf16 %v88_v50, %v88_v50  ;;  %v1474_v8 = vld [vmem:[%s1987_s1 + $0x118] sm:$0xff]   ;;  %v1476_v10 = vld [vmem:[%s1987_s1 + $0x150] sm:$0xff]   ;;  %v1480_v14 = vld [vmem:[%s1987_s1 + $0x148] sm:$0xff]  }
  0x14   :  { %1240 = vmatpush3.bf16.msra.mxu0 %v1436_v18  ;;  %v138_v57 = vpack.c.bf16 %v90_v51, %v90_v51  ;;  %v1475_v9 = vld [vmem:[%s1987_s1 + $0x198] sm:$0xff]   ;;  %v1477_v11 = vld [vmem:[%s1987_s1 + $0x1d0] sm:$0xff]   ;;  %v1481_v15 = vld [vmem:[%s1987_s1 + $0x1c8] sm:$0xff]  }
  0x15   :  { %1262 = vmatpush3.bf16.msra.mxu1 %v1437_v19  ;;  %1241 = vmatprep.subr.bf16.mxu0 %v1438_v20  ;;  %v1478_v12 = vld [vmem:[%s1987_s1 + $0x110] sm:$0xff]   ;;  %v1482_v16 = vld [vmem:[%s1987_s1 + $0x108] sm:$0xff]   ;;  %v1484_v18 = vld [vmem:[%s1987_s1 + $0x140] sm:$0xff]  }
  0x16   :  { %1263 = vmatprep.subr.bf16.mxu1 %v1439_v21  ;;  %689 = vmatprep.mubr.bf16.mxu0 %v137_v54  ;;  %v1479_v13 = vld [vmem:[%s1987_s1 + $0x190] sm:$0xff]   ;;  %v1483_v17 = vld [vmem:[%s1987_s1 + $0x188] sm:$0xff]   ;;  %v1485_v19 = vld [vmem:[%s1987_s1 + $0x1c0] sm:$0xff]  }
  0x17   :  { %729 = vmatprep.mubr.bf16.mxu1 %v139_v55  ;;  %v1488_v20 = vld [vmem:[%s1986_s0 + $0x8] ss:$16 sps:$4 sm:$0xff]  }
  0x18   :  { %1242 = vmatpush3.bf16.msra.mxu0 %v1440_v22  ;;  %v1490_v21 = vld [vmem:[%s1986_s0 + $0x28] ss:$16 sps:$4 sm:$0xff]   ;;  %v1492_v22 = vld [vmem:[%s1986_s0 + $0xc] ss:$16 sps:$4 sm:$0xff]  }
  0x19   :  { %1264 = vmatpush3.bf16.msra.mxu1 %v1441_v23  ;;  %1243 = vmatprep.subr.bf16.mxu0 %v1442_v24  ;;  %v1493_v23 = vld [vmem:[%s1986_s0 + $0x2c] ss:$16 sps:$4 sm:$0xff]   ;;  %v102_v24 = vrot.slane %v1488_v20, %v1691_v43 }
  0x1a   :  { %1265 = vmatprep.subr.bf16.mxu1 %v1443_v25  ;;  %v116_v25 = vrot.slane %v1490_v21, %v1691_v43 }
  0x1c   :  { %1244 = vmatpush3.bf16.msra.mxu0 %v1444_v26  ;;  %v1486_v26 = vld [vmem:[%s1987_s1 + $0x100] sm:$0xff]  }
  0x1d   :  { %1266 = vmatpush3.bf16.msra.mxu1 %v1445_v27  ;;  %1245 = vmatprep.subr.bf16.mxu0 %v1446_v28  ;;  %v1487_v27 = vld [vmem:[%s1987_s1 + $0x180] sm:$0xff]   ;;  %v109_v28 = vrot.slane %v1492_v22, %v1691_v43 }
  0x1e   :  { %1267 = vmatprep.subr.bf16.mxu1 %v1447_v30  ;;  %v123_v30 = vrot.slane %v1493_v23, %v1691_v43 }
  0x20   :  { %1246 = vmatpush3.bf16.msra.mxu0 %v1448_v31  ;;  %v125_v31 = vcombine.high %v102_v24, %v116_v25  ;;  %v127_v33 = vcombine.high %v109_v28, %v123_v30  ;;  %v126_v34 = vcombine.low %v109_v28, %v123_v30  ;;  %v872_v28 = vld [vmem:[%s1989_s3] sm:$0xff]  ;;  %v975_v30 = vld [vmem:[%s1991_s5 + $0x78] sm:$0xff] }
  0x21   :  { %1268 = vmatpush3.bf16.msra.mxu1 %v1449_v32  ;;  %1275 = vmatprep.subr.bf16.mxu0 %v1456_v41  ;;  %v124_v32 = vcombine.low %v102_v24, %v116_v25 }
  0x22   :  { %1297 = vmatprep.subr.bf16.mxu1 %v1457_v42  ;;  %v141_v35 = vpack.c.bf16 %v125_v31, %v125_v31  ;;  %v143_v37 = vpack.c.bf16 %v127_v33, %v127_v33  ;;  %v142_v38 = vpack.c.bf16 %v126_v34, %v126_v34  ;;  %v974_v31 = vld [vmem:[%s1991_s5 + $0x70] sm:$0xff]  ;;  %v972_v33 = vld [vmem:[%s1991_s5 + $0x60] sm:$0xff]  ;;  %v971_v34 = vld [vmem:[%s1991_s5 + $0x58] sm:$0xff] }
  0x23   :  { %690 = vmatmul.mubr.bf16.vlgmr.msra.gmra.mxu0 %v136_v56  ;;  %v140_v36 = vpack.c.bf16 %v124_v32, %v124_v32  ;;  %v973_v32 = vld [vmem:[%s1991_s5 + $0x68] sm:$0xff] }
  0x24   :  { %730 = vmatmul.mubr.bf16.vlgmr.msra.gmra.mxu1 %v138_v57  ;;  %1276 = vmatpush3.bf16.msra.mxu0 %v1458_v52 }
  0x25   :  { %1298 = vmatpush3.bf16.msra.mxu1 %v1459_v53  ;;  %1277 = vmatprep.subr.bf16.mxu0 %v1460_v58 }
  0x26   :  { %1299 = vmatprep.subr.bf16.mxu1 %v1461_v59  ;;  %769 = vmatprep.mubr.bf16.mxu0 %v141_v35  ;;  %v970_v35 = vld [vmem:[%s1991_s5 + $0x50] sm:$0xff] }
  0x27   :  { %809 = vmatprep.mubr.bf16.mxu1 %v143_v37  ;;  %v968_v37 = vld [vmem:[%s1991_s5 + $0x40] sm:$0xff] }
  0x28   :  { %1278 = vmatpush3.bf16.msra.mxu0 %v1462_v60  ;;  %v144_v60 = vld [vmem:[#allocation2] sm:$0xff] }
  0x29   :  { %1300 = vmatpush3.bf16.msra.mxu1 %v1463_v61  ;;  %1279 = vmatprep.subr.bf16.mxu0 %v1464_v62 }
  0x2a   :  { %1301 = vmatprep.subr.bf16.mxu1 %v1465_v63 }
  0x2c   :  { %1280 = vmatpush3.bf16.msra.mxu0 %v1466_v0 }
  0x2d   :  { %1302 = vmatpush3.bf16.msra.mxu1 %v1467_v1  ;;  %1281 = vmatprep.subr.bf16.mxu0 %v1468_v2  ;;  %v1808_v1 = vand.u32 127, %v63_v29  ;;  %v1224_v2 = vld [vmem:[%s1988_s2] ss:$0 sm:$0xff] }
  0x2e   :  { %1303 = vmatprep.subr.bf16.mxu1 %v1469_v3  ;;  %v1228_v3 = vld [vmem:[%s1992_s6] ss:$0 sm:$0xff] }
  0x2f   :  { %vm835_vm1 = vcmp.ge.s32.totalorder %v1808_v1, 7  ;;  %vm836_vm2 = vcmp.lt.s32.totalorder %v1808_v1, 14  ;;  %vm834_vm4 = vcmp.lt.s32.totalorder %v1808_v1, 7  ;;  %v1055_v1 = vld [vmem:[%s1993_s7 + $0x8] sm:$0xff] }
  0x30   :  { %1282 = vmatpush3.bf16.msra.mxu0 %v1470_v4  ;;  %vm1816_vm3 = vmand %vm835_vm1, %vm836_vm2 }
  0x31   :  { %1304 = vmatpush3.bf16.msra.mxu1 %v1471_v5  ;;  %1283 = vmatprep.subr.bf16.mxu0 %v1472_v6  ;;  %vm1825_vm5 = vmor %vm834_vm4, %vm1816_vm3 }
  0x32   :  { %1305 = vmatprep.subr.bf16.mxu1 %v1473_v7 }
  0x34   :  { %1284 = vmatpush3.bf16.msra.mxu0 %v1474_v8 }
  0x35   :  { %1306 = vmatpush3.bf16.msra.mxu1 %v1475_v9  ;;  %1285 = vmatprep.subr.bf16.mxu0 %v1476_v10 }
  0x36   :  { %1307 = vmatprep.subr.bf16.mxu1 %v1477_v11 }
  0x38   :  { %1286 = vmatpush3.bf16.msra.mxu0 %v1478_v12 }
  0x39   :  { %1308 = vmatpush3.bf16.msra.mxu1 %v1479_v13  ;;  %1287 = vmatprep.subr.bf16.mxu0 %v1480_v14 }
  0x3a   :  { %1309 = vmatprep.subr.bf16.mxu1 %v1481_v15 }
  0x3c   :  { %1288 = vmatpush3.bf16.msra.mxu0 %v1482_v16 }
  0x3d   :  { %1310 = vmatpush3.bf16.msra.mxu1 %v1483_v17  ;;  %1289 = vmatprep.subr.bf16.mxu0 %v1484_v18 }
  0x3e   :  { %1311 = vmatprep.subr.bf16.mxu1 %v1485_v19 }
  0x40   :  { %1290 = vmatpush3.bf16.msra.mxu0 %v1486_v26  ;;  %v874_v26 = vld [vmem:[%s1989_s3 + $0x10] sm:$0x1f] }
  0x41   :  { %1312 = vmatpush3.bf16.msra.mxu1 %v1487_v27  ;;  %1349 = vmatprep.subr.mxu0 %v1521_v39  ;;  %v873_v27 = vld [vmem:[%s1989_s3 + $0x8] sm:$0xff] }
  0x42   :  { %1358 = vmatprep.subr.mxu1 %v1521_v39 }
  0x43   :  { %770 = vmatmul.mubr.bf16.vlgmr.msra.gmra.mxu0 %v140_v36  ;;  %v969_v36 = vld [vmem:[%s1991_s5 + $0x48] sm:$0xff] }
  0x44   :  { %810 = vmatmul.mubr.bf16.vlgmr.msra.gmra.mxu1 %v142_v38  ;;  %1350 = vmatpush3.msk.msra.mxu0 %vm885_vm6, %v874_v26  ;;  %v967_v38 = vld [vmem:[%s1991_s5 + $0x38] sm:$0xff] }
  0x45   :  { %1355 = vmatprep.mubr.msk.f32.mxu0 %vm1522_vm7, %v1521_v39  ;;  %1351 = vmatprep.subr.mxu0 %v1521_v39 }
  0x46   :  { %1390 = vmatprep.mubr.msk.f32.mxu1 %vm1522_vm7, %v1521_v39  ;;  %1352 = vmatpush3.msra.mxu0 %v873_v27 }
  0x47   :  { %1353 = vmatprep.subr.mxu0 %v1521_v39  ;;  %1359 = vmatpush3.msra.mxu1 %v975_v30 }
  0x48   :  { %1354 = vmatpush3.msra.mxu0 %v872_v28  ;;  %1360 = vmatprep.subr.mxu1 %v1521_v39 }
  0x49   :  { %1393 = vmatprep.subr.mxu0 %v1521_v39  ;;  %1361 = vmatpush3.msra.mxu1 %v974_v31 }
  0x4a   :  { %1362 = vmatprep.subr.mxu1 %v1521_v39 }
  0x4b   :  { %1363 = vmatpush3.msra.mxu1 %v973_v32 }
  0x4c   :  { %1364 = vmatprep.subr.mxu1 %v1521_v39 }
  0x4d   :  { %1365 = vmatpush3.msra.mxu1 %v972_v33 }
  0x4e   :  { %1366 = vmatprep.subr.mxu1 %v1521_v39 }
  0x4f   :  { %1367 = vmatpush3.msra.mxu1 %v971_v34 }
  0x50   :  { %1368 = vmatprep.subr.mxu1 %v1521_v39 }
  0x51   :  { %1369 = vmatpush3.msra.mxu1 %v970_v35 }
  0x52   :  { %1370 = vmatprep.subr.mxu1 %v1521_v39 }
  0x53   :  { %1371 = vmatpush3.msra.mxu1 %v969_v36 }
  0x54   :  { %1372 = vmatprep.subr.mxu1 %v1521_v39 }
  0x55   :  { %1373 = vmatpush3.msra.mxu1 %v968_v37 }
  0x56   :  { %1374 = vmatprep.subr.mxu1 %v1521_v39 }
  0x57   :  { %1375 = vmatpush3.msra.mxu1 %v967_v38 }
  0x58   :  { %1376 = vmatprep.subr.mxu1 %v1521_v39 }
  0xe3   :  { %v1247_v40 = vpop.f32.mrf.mxu0 }
  0xe4   :  { %v1269_v41 = vpop.f32.mrf.mxu1 }
  0xe5   :  { %v1248_v42 = vpop.f32.mrf.mxu0 }
  0xe6   :  { %v1270_v43 = vpop.f32.mrf.mxu1  ;;  %v1249_v48 = vadd.f32 %v1248_v42, %v1247_v40  ;;  %v966_v40 = vld [vmem:[%s1991_s5 + $0x30] sm:$0xff]  ;;  %v964_v42 = vld [vmem:[%s1991_s5 + $0x20] sm:$0xff] }
  0xe7   :  { %v1250_v44 = vpop.f32.mrf.mxu0  ;;  %v1271_v49 = vadd.f32 %v1270_v43, %v1269_v41  ;;  %v965_v41 = vld [vmem:[%s1991_s5 + $0x28] sm:$0xff]  ;;  %1377 = vmatpush3.msra.mxu1 %v966_v40  ;;  %v963_v43 = vld [vmem:[%s1991_s5 + $0x18] sm:$0xff] }
  0xe8   :  { %v1272_v45 = vpop.f32.mrf.mxu1  ;;  %1378 = vmatprep.subr.mxu1 %v1521_v39 }
  0xe9   :  { %v1251_v46 = vpop.f32.mrf.mxu0  ;;  %v732_v54 = vadd.f32 %v1271_v49, %v1249_v48  ;;  %1379 = vmatpush3.msra.mxu1 %v965_v41 }
  0xea   :  { %v1273_v47 = vpop.f32.mrf.mxu1  ;;  %1380 = vmatprep.subr.mxu1 %v1521_v39 }
  0xeb   :  { %1381 = vmatpush3.msra.mxu1 %v964_v42 }
  0xec   :  { %1382 = vmatprep.subr.mxu1 %v1521_v39 }
  0xed   :  { %1383 = vmatpush3.msra.mxu1 %v963_v43 }
  0xee   :  { %1384 = vmatprep.subr.mxu1 %v1521_v39 }
 0x103   :  { %v1291_v50 = vpop.f32.mrf.mxu0 }
 0x104   :  { %v1313_v51 = vpop.f32.mrf.mxu1 }
 0x105   :  { %v1292_v52 = vpop.f32.mrf.mxu0 }
 0x106   :  { %v1314_v53 = vpop.f32.mrf.mxu1  ;;  %v1293_v55 = vadd.f32 %v1292_v52, %v1291_v50  ;;  %v961_v52 = vld [vmem:[%s1991_s5 + $0x8] sm:$0xff] }
 0x107   :  { %v1294_v56 = vpop.f32.mrf.mxu0  ;;  %v1315_v59 = vadd.f32 %v1314_v53, %v1313_v51  ;;  %v962_v51 = vld [vmem:[%s1991_s5 + $0x10] sm:$0xff]  ;;  %v960_v53 = vld [vmem:[%s1991_s5] sm:$0xff] }
 0x108   :  { %v1316_v57 = vpop.f32.mrf.mxu1  ;;  %v772_v58 = vadd.f32 %v1293_v55, %v732_v54  ;;  %1385 = vmatpush3.msra.mxu1 %v962_v51  ;;  %v1061_v54 = vld [vmem:[%s1993_s7 + $0x38] sm:$0xff]  ;;  %v1060_v55 = vld [vmem:[%s1993_s7 + $0x30] sm:$0xff]  ;;  %v1059_v56 = vld [vmem:[%s1993_s7 + $0x28] sm:$0xff] }
 0x109   :  { %v1295_v61 = vpop.f32.mrf.mxu0  ;;  %1386 = vmatprep.subr.mxu1 %v1521_v39  ;;  %v1058_v57 = vld [vmem:[%s1993_s7 + $0x20] sm:$0xff] }
 0x10a   :  { %v1317_v62 = vpop.f32.mrf.mxu1  ;;  %v812_v63 = vadd.f32 %v1315_v59, %v772_v58  ;;  %1387 = vmatpush3.msra.mxu1 %v961_v52  ;;  %v1057_v58 = vld [vmem:[%s1993_s7 + $0x18] sm:$0xff]  ;;  %v1225_v59 = vld [vmem:[%s1990_s4] ss:$0 sm:$0xff] }
 0x10b   :  { %1388 = vmatprep.subr.mxu1 %v1521_v39 }
 0x10c   :  { %v817_v0 = vadd.f32 %v812_v63, %v144_v60  ;;  %1389 = vmatpush3.msra.mxu1 %v960_v53 }
 0x10e   :  { %819 = vst.msk [vmem:[#allocation2] sm:$0xff] %vm38_vm0, %v817_v0  ;;  %v1056_v0 = vld [vmem:[%s1993_s7 + $0x10] sm:$0xff] }
 0x115   :  { %v823_v4 = vld [vmem:[#allocation2] sm:$0xff] }
 0x116   :  { %v831_v5 = vadd.f32 %v1224_v2, %v823_v4  ;;  %v1054_v2 = vld [vmem:[%s1993_s7] sm:$0xff] }
 0x118   :  { %v842_v6 = vsel %vm1816_vm3, %v831_v5, -inf  ;;  %v838_v7 = vsel %vm834_vm4, %v831_v5, -inf  ;;  %v847_v10 = vsel %vm1825_vm5, -inf, %v831_v5 }
 0x119   :  { %v843_v8 = vsel %vm38_vm0, %v842_v6, -inf  ;;  %v839_v9 = vsel %vm38_vm0, %v838_v7, -inf  ;;  %v848_v11 = vsel %vm38_vm0, %v847_v10, -inf  ;;  %v1229_v7 = vld [vmem:[%s1994_s8] ss:$0 sm:$0xff] }
 0x11a   :  { %844 = vmax.xlane.f32.xlu0 %v843_v8  ;;  %840 = vmax.xlane.f32.xlu1 %v839_v9 }
 0x11e   :  { %849 = vmax.xlane.f32.xlu0 %v848_v11 }
 0x1a3   :  { %v845_v12 = vpop.xlane.xlu0 %844  ;;  %v841_v14 = vpop.xlane.xlu1 %840 }
 0x1a7   :  { %v850_v13 = vpop.xlane.xlu0 %849 }
 0x1a8   :  { %v851_v15 = vsel %vm1816_vm3, %v845_v12, %v850_v13 }
 0x1a9   :  { %v852_v16 = vsel %vm834_vm4, %v841_v14, %v851_v15 }
 0x1aa   :  { %v853_v17 = vsub.f32 %v831_v5, %v852_v16 }
 0x1ac   :  { %v854_v18 = vmul.f32 1.442695, %v853_v17 }
 0x1ae   :  { %1494 = vpow2.f32 %v854_v18 }
 0x1bb   :  { %v1842_v19 = vpop.eup %1494 }
 0x1bc   :  { %v864_v20 = vsel %vm1825_vm5, 0.0, %v1842_v19  ;;  %v860_v21 = vsel %vm1816_vm3, %v1842_v19, 0.0  ;;  %v856_v24 = vsel %vm834_vm4, %v1842_v19, 0.0 }
 0x1bd   :  { %v865_v22 = vsel %vm38_vm0, %v864_v20, 0.0  ;;  %v861_v23 = vsel %vm38_vm0, %v860_v21, 0.0  ;;  %v857_v25 = vsel %vm38_vm0, %v856_v24, 0.0 }
 0x1be   :  { %866 = vadd.xlane.f32.xlu0 %v865_v22  ;;  %862 = vadd.xlane.f32.xlu1 %v861_v23 }
 0x1c2   :  { %858 = vadd.xlane.f32.xlu1 %v857_v25 }
 0x247   :  { %v863_v44 = vpop.xlane.xlu1 %862  ;;  %v867_v45 = vpop.xlane.xlu0 %866 }
 0x248   :  { %v868_v46 = vsel %vm1816_vm3, %v863_v44, %v867_v45 }
 0x24b   :  { %v859_v47 = vpop.xlane.xlu1 %858 }
 0x24c   :  { %v869_v48 = vsel %vm834_vm4, %v859_v47, %v868_v46 }
 0x24d   :  { %1496 = vrcp.f32 %v869_v48 }
 0x25a   :  { %v1497_v49 = vpop.eup %1496 }
 0x25b   :  { %v871_v50 = vmul.f32 %v1497_v49, %v1842_v19 }
 0x25d   :  { %1356 = vmatmul.mubr.msk.f32.vlgmr.msra.gmra.mxu0 %vm38_vm0, %v871_v50 }
 0x25e   :  { %1409 = vmatprep.mubr.msk.f32.mxu0 %vm1522_vm7, %v1521_v39  ;;  %1394 = vmatpush3.msra.mxu0 %v1061_v54 }
 0x25f   :  { %1395 = vmatprep.subr.mxu0 %v1521_v39 }
 0x260   :  { %1396 = vmatpush3.msra.mxu0 %v1060_v55 }
 0x261   :  { %1397 = vmatprep.subr.mxu0 %v1521_v39 }
 0x262   :  { %1398 = vmatpush3.msra.mxu0 %v1059_v56 }
 0x263   :  { %1399 = vmatprep.subr.mxu0 %v1521_v39 }
 0x264   :  { %1400 = vmatpush3.msra.mxu0 %v1058_v57 }
 0x265   :  { %1401 = vmatprep.subr.mxu0 %v1521_v39 }
 0x266   :  { %1402 = vmatpush3.msra.mxu0 %v1057_v58 }
 0x267   :  { %1403 = vmatprep.subr.mxu0 %v1521_v39 }
 0x268   :  { %1404 = vmatpush3.msra.mxu0 %v1056_v0 }
 0x269   :  { %1405 = vmatprep.subr.mxu0 %v1521_v39 }
 0x26a   :  { %1406 = vmatpush3.msra.mxu0 %v1055_v1 }
 0x26b   :  { %1407 = vmatprep.subr.mxu0 %v1521_v39 }
 0x26c   :  { %1408 = vmatpush3.msra.mxu0 %v1054_v2 }
 0x31d   :  { %v955_v60 = vpop.f32.mrf.mxu0 }
 0x31e   :  { %v956_v61 = vadd.f32 %v1225_v59, %v955_v60 }
 0x31f   :  { %v1357_v62 = vpop.f32.mrf.mxu0 }
 0x320   :  { %v959_v63 = vmax.f32 %v956_v61, 0.0 }
 0x322   :  { %1391 = vmatmul.mubr.f32.vlgmr.msra.gmra.mxu1 %v959_v63 }
 0x3e2   :  { %v1049_v4 = vpop.f32.mrf.mxu1 }
 0x3e3   :  { %v1050_v5 = vadd.f32 %v1228_v3, %v1049_v4 }
 0x3e4   :  { %v1392_v29 = vpop.f32.mrf.mxu1 }
 0x3e5   :  { %v1053_v6 = vmax.f32 %v1050_v5, 0.0 }
 0x3e7   :  { %1410 = vmatmul.mubr.msk.f32.vlgmr.msra.gmra.mxu0 %vm1069_vm8, %v1053_v6 }
 0x4a7   :  { %v1139_v39 = vpop.f32.mrf.mxu0 }
 0x4a8   :  { %v1140_v8 = vadd.f32 %v1229_v7, %v1139_v39 }
 0x4a9   :  { %v1411_v9 = vpop.f32.mrf.mxu0 }
 0x4aa   :  { %1143 = vst [vmem:[#allocation3] sm:$0xff] %v1140_v8 }
 0x4ab   :  { %1148 = vsyncadd [#allocation4], 96  ;;  %s1523_s7 = smov [#allocation3]  }
 0x4ac   :  { %s1149_s13 = sshll.u32 %s1523_s7, 4  ;;  %s1150_s13 = int_to_ptr.vmem [resolvable:$true] %s1149_s13 }
 0x4ad   :  { %s1498_s14 = scalar_lea.vmem %s1150_s13, 32  ;;  %s1502_s6 = scalar_lea.vmem %s1150_s13, 128 }
 0x4ae   :  { %p1499_p0 = scmp.ne.s32.totalorder %s1150_s13, %s1498_s14  ;;  %p1503_p1 = scmp.lt.s32.totalorder %s1150_s13, %s1150_s13 }
 0x4af   :  { %p1504_p2 = scmp.lt.s32.totalorder %s1502_s6, %s1498_s14 }
 0x4b1   :  { %p1505_p3 = por %p1504_p2, %p1503_p1 }
 0x4b3   :  { %p1506_p4 = pnand %p1505_p3, %p1499_p0 }
 0x4b5   :  { %1509 = shalt.err (!%p1506_p4)
}
 0x4b6   :  { %s1524_s3 = smov 32   ;;  %s1525_s15 = smov 2  }
 0x4b7   :  { %1155 = dma.vmem_to_hbm [thread:$0]  %s1150_s13, 32, %s1995_s9, [#allocation4], %s1524_s3, %s1524_s3, %s1525_s15  }
 0x4b8   :  { %1518 = dma.done.wait [#allocation4], 128  }
 0x4b9   :  { %1519 = vsyncadd [#allocation4], 4294967168 }
 0x4ba   :  { %1159 = vsyncpa [#allocation4], 1 }

// kernel: meta_learner_forward.1
= control target key start
LH: loop header
LB: loop body
LE: loop exit
PB: predicated region body
PF: predicated region fallthrough
CT: control target
= control target key end

     0   :  { %14 = vsyncpa [#allocation4], 0  ;;  %v63_v29 = vlaneseq  ;;  %v1520_v34 = vmov 1983009808   ;;  %vm38_vm0 = vcmask 171008   ;;  %vm885_vm6 = vcmask 1044480   ;;  %s1986_s0 = inlined_call_operand.vmem [shape: f32[2,1024], index: 0, kind: input, shape index: {}]   ;;  %s1987_s1 = inlined_call_operand.vmem [shape: bf16[1024,21], index: 1, kind: input, shape index: {}]   ;;  %s1988_s2 = inlined_call_operand.vmem [shape: f32[1,21], index: 2, kind: input, shape index: {}]   ;;  %s1989_s3 = inlined_call_operand.vmem [shape: f32[21,128], index: 3, kind: input, shape index: {}]   ;;  %s1990_s4 = inlined_call_operand.vmem [shape: f32[1,128], index: 4, kind: input, shape index: {}]   ;;  %s1991_s5 = inlined_call_operand.vmem [shape: f32[128,64], index: 5, kind: input, shape index: {}]   ;;  %s1992_s6 = inlined_call_operand.vmem [shape: f32[1,64], index: 6, kind: input, shape index: {}]   ;;  %s1993_s7 = inlined_call_operand.vmem [shape: f32[64,128], index: 7, kind: input, shape index: {}]   ;;  %s1994_s8 = inlined_call_operand.vmem [shape: f32[1,128], index: 8, kind: input, shape index: {}]   ;;  %s1995_s9 = inlined_call_operand.hbm [shape: f32[2,128], index: 9, kind: output, shape index: {}]  }
   0x1   :  { %v1418_v0 = vld [vmem:[%s1987_s1 + $0x78] sm:$0xff]   ;;  %v1422_v4 = vld [vmem:[%s1987_s1 + $0x70] sm:$0xff]   ;;  %v1426_v8 = vld [vmem:[%s1987_s1 + $0x68] sm:$0xff]   ;;  %v61_v35 = vunpack.c.l.s4 %v1520_v34  ;;  %vm1522_vm7 = vmmov 0   ;;  %vm1069_vm8 = vcmask 523264  }
   0x2   :  { %v1419_v1 = vld [vmem:[%s1987_s1 + $0xf8] sm:$0xff]   ;;  %1231 = vmatprep.subr.bf16.mxu0 %v1418_v0  ;;  %v1423_v5 = vld [vmem:[%s1987_s1 + $0xf0] sm:$0xff]   ;;  %v1427_v9 = vld [vmem:[%s1987_s1 + $0xe8] sm:$0xff]   ;;  %v64_v36 = vshrl.u32 %v63_v29, 7 }
   0x3   :  { %v1420_v2 = vld [vmem:[%s1987_s1 + $0x38] sm:$0xff]   ;;  %1253 = vmatprep.subr.bf16.mxu1 %v1419_v1  ;;  %v1424_v6 = vld [vmem:[%s1987_s1 + $0x30] sm:$0xff]   ;;  %v1428_v10 = vld [vmem:[%s1987_s1 + $0x28] sm:$0xff]   ;;  %v62_v40 = vunpack.c.0.s8 %v61_v35 }
   0x4   :  { %v1421_v3 = vld [vmem:[%s1987_s1 + $0xb8] sm:$0xff]   ;;  %1232 = vmatpush3.bf16.msra.mxu0 %v1420_v2  ;;  %v1425_v7 = vld [vmem:[%s1987_s1 + $0xb0] sm:$0xff]   ;;  %v1429_v11 = vld [vmem:[%s1987_s1 + $0xa8] sm:$0xff]  }
   0x5   :  { %1254 = vmatpush3.bf16.msra.mxu1 %v1421_v3  ;;  %1233 = vmatprep.subr.bf16.mxu0 %v1422_v4  ;;  %v1430_v12 = vld [vmem:[%s1987_s1 + $0x60] sm:$0xff]   ;;  %v1434_v16 = vld [vmem:[%s1987_s1 + $0x58] sm:$0xff]   ;;  %v1438_v20 = vld [vmem:[%s1987_s1 + $0x50] sm:$0xff]   ;;  %v1691_v43 = vsub.s32 %v62_v40, %v64_v36 }
   0x6   :  { %1255 = vmatprep.subr.bf16.mxu1 %v1423_v5  ;;  %v1431_v13 = vld [vmem:[%s1987_s1 + $0xe0] sm:$0xff]   ;;  %v1435_v17 = vld [vmem:[%s1987_s1 + $0xd8] sm:$0xff]   ;;  %v1439_v21 = vld [vmem:[%s1987_s1 + $0xd0] sm:$0xff]  }
   0x7   :  { %v1432_v14 = vld [vmem:[%s1987_s1 + $0x20] sm:$0xff]   ;;  %v1436_v18 = vld [vmem:[%s1987_s1 + $0x18] sm:$0xff]   ;;  %v1440_v22 = vld [vmem:[%s1987_s1 + $0x10] sm:$0xff]  }
   0x8   :  { %1234 = vmatpush3.bf16.msra.mxu0 %v1424_v6  ;;  %v1433_v15 = vld [vmem:[%s1987_s1 + $0xa0] sm:$0xff]   ;;  %v1437_v19 = vld [vmem:[%s1987_s1 + $0x98] sm:$0xff]   ;;  %v1441_v23 = vld [vmem:[%s1987_s1 + $0x90] sm:$0xff]  }
   0x9   :  { %1256 = vmatpush3.bf16.msra.mxu1 %v1425_v7  ;;  %1235 = vmatprep.subr.bf16.mxu0 %v1426_v8  ;;  %v1442_v24 = vld [vmem:[%s1987_s1 + $0x48] sm:$0xff]   ;;  %v1446_v28 = vld [vmem:[%s1987_s1 + $0x40] sm:$0xff]   ;;  %v1456_v41 = vld [vmem:[%s1987_s1 + $0x178] sm:$0xff]  }
   0xa   :  { %1257 = vmatprep.subr.bf16.mxu1 %v1427_v9  ;;  %v1443_v25 = vld [vmem:[%s1987_s1 + $0xc8] sm:$0xff]   ;;  %v1447_v30 = vld [vmem:[%s1987_s1 + $0xc0] sm:$0xff]   ;;  %v1457_v42 = vld [vmem:[%s1987_s1 + $0x1f8] sm:$0xff]  }
   0xb   :  { %v1444_v26 = vld [vmem:[%s1987_s1 + $0x8] sm:$0xff]   ;;  %v1448_v31 = vld [vmem:[%s1987_s1] sm:$0xff]   ;;  %v1458_v52 = vld [vmem:[%s1987_s1 + $0x138] sm:$0xff]  }
   0xc   :  { %1236 = vmatpush3.bf16.msra.mxu0 %v1428_v10  ;;  %v1445_v27 = vld [vmem:[%s1987_s1 + $0x88] sm:$0xff]   ;;  %v1449_v32 = vld [vmem:[%s1987_s1 + $0x80] sm:$0xff]   ;;  %v1459_v53 = vld [vmem:[%s1987_s1 + $0x1b8] sm:$0xff]  }
   0xd   :  { %1258 = vmatpush3.bf16.msra.mxu1 %v1429_v11  ;;  %1237 = vmatprep.subr.bf16.mxu0 %v1430_v12  ;;  %v1450_v33 = vld [vmem:[%s1986_s0] ss:$16 sps:$4 sm:$0xff]   ;;  %v1454_v38 = vld [vmem:[%s1986_s0 + $0x4] ss:$16 sps:$4 sm:$0xff]   ;;  %v1464_v62 = vld [vmem:[%s1987_s1 + $0x168] sm:$0xff]  }
   0xe   :  { %1259 = vmatprep.subr.bf16.mxu1 %v1431_v13  ;;  %v1452_v37 = vld [vmem:[%s1986_s0 + $0x20] ss:$16 sps:$4 sm:$0xff]   ;;  %v1455_v39 = vld [vmem:[%s1986_s0 + $0x24] ss:$16 sps:$4 sm:$0xff]   ;;  %v66_v44 = vrot.slane %v1450_v33, %v1691_v43  ;;  %v73_v46 = vrot.slane %v1454_v38, %v1691_v43  ;;  %v1465_v63 = vld [vmem:[%s1987_s1 + $0x1e8] sm:$0xff]  }
   0xf   :  { %v80_v45 = vrot.slane %v1452_v37, %v1691_v43  ;;  %v87_v47 = vrot.slane %v1455_v39, %v1691_v43  ;;  %v1460_v58 = vld [vmem:[%s1987_s1 + $0x170] sm:$0xff]   ;;  %v1466_v0 = vld [vmem:[%s1987_s1 + $0x128] sm:$0xff]   ;;  %v1468_v2 = vld [vmem:[%s1987_s1 + $0x160] sm:$0xff]   ;;  %v1521_v39 = vmov 0.0  }
  0x10   :  { %1238 = vmatpush3.bf16.msra.mxu0 %v1432_v14  ;;  %v1461_v59 = vld [vmem:[%s1987_s1 + $0x1f0] sm:$0xff]   ;;  %v1467_v1 = vld [vmem:[%s1987_s1 + $0x1a8] sm:$0xff]   ;;  %v1469_v3 = vld [vmem:[%s1987_s1 + $0x1e0] sm:$0xff]   ;;  %39 = vst.msk [vmem:[#allocation2] sm:$0xff] %vm38_vm0, %v1521_v39 }
  0x11   :  { %1260 = vmatpush3.bf16.msra.mxu1 %v1433_v15  ;;  %1239 = vmatprep.subr.bf16.mxu0 %v1434_v16  ;;  %v89_v48 = vcombine.high %v66_v44, %v80_v45  ;;  %v91_v49 = vcombine.high %v73_v46, %v87_v47  ;;  %v88_v50 = vcombine.low %v66_v44, %v80_v45  ;;  %v1462_v60 = vld [vmem:[%s1987_s1 + $0x130] sm:$0xff]   ;;  %v1470_v4 = vld [vmem:[%s1987_s1 + $0x120] sm:$0xff]   ;;  %v1472_v6 = vld [vmem:[%s1987_s1 + $0x158] sm:$0xff]  }
  0x12   :  { %1261 = vmatprep.subr.bf16.mxu1 %v1435_v17  ;;  %v90_v51 = vcombine.low %v73_v46, %v87_v47  ;;  %v1463_v61 = vld [vmem:[%s1987_s1 + $0x1b0] sm:$0xff]   ;;  %v1471_v5 = vld [vmem:[%s1987_s1 + $0x1a0] sm:$0xff]   ;;  %v1473_v7 = vld [vmem:[%s1987_s1 + $0x1d8] sm:$0xff]  }
  0x13   :  { %v137_v54 = vpack.c.bf16 %v89_v48, %v89_v48  ;;  %v139_v55 = vpack.c.bf16 %v91_v49, %v91_v49  ;;  %v136_v56 = vpack.c.bf16 %v88_v50, %v88_v50  ;;  %v1474_v8 = vld [vmem:[%s1987_s1 + $0x118] sm:$0xff]   ;;  %v1476_v10 = vld [vmem:[%s1987_s1 + $0x150] sm:$0xff]   ;;  %v1480_v14 = vld [vmem:[%s1987_s1 + $0x148] sm:$0xff]  }
  0x14   :  { %1240 = vmatpush3.bf16.msra.mxu0 %v1436_v18  ;;  %v138_v57 = vpack.c.bf16 %v90_v51, %v90_v51  ;;  %v1475_v9 = vld [vmem:[%s1987_s1 + $0x198] sm:$0xff]   ;;  %v1477_v11 = vld [vmem:[%s1987_s1 + $0x1d0] sm:$0xff]   ;;  %v1481_v15 = vld [vmem:[%s1987_s1 + $0x1c8] sm:$0xff]  }
  0x15   :  { %1262 = vmatpush3.bf16.msra.mxu1 %v1437_v19  ;;  %1241 = vmatprep.subr.bf16.mxu0 %v1438_v20  ;;  %v1478_v12 = vld [vmem:[%s1987_s1 + $0x110] sm:$0xff]   ;;  %v1482_v16 = vld [vmem:[%s1987_s1 + $0x108] sm:$0xff]   ;;  %v1484_v18 = vld [vmem:[%s1987_s1 + $0x140] sm:$0xff]  }
  0x16   :  { %1263 = vmatprep.subr.bf16.mxu1 %v1439_v21  ;;  %689 = vmatprep.mubr.bf16.mxu0 %v137_v54  ;;  %v1479_v13 = vld [vmem:[%s1987_s1 + $0x190] sm:$0xff]   ;;  %v1483_v17 = vld [vmem:[%s1987_s1 + $0x188] sm:$0xff]   ;;  %v1485_v19 = vld [vmem:[%s1987_s1 + $0x1c0] sm:$0xff]  }
  0x17   :  { %729 = vmatprep.mubr.bf16.mxu1 %v139_v55  ;;  %v1488_v20 = vld [vmem:[%s1986_s0 + $0x8] ss:$16 sps:$4 sm:$0xff]  }
  0x18   :  { %1242 = vmatpush3.bf16.msra.mxu0 %v1440_v22  ;;  %v1490_v21 = vld [vmem:[%s1986_s0 + $0x28] ss:$16 sps:$4 sm:$0xff]   ;;  %v1492_v22 = vld [vmem:[%s1986_s0 + $0xc] ss:$16 sps:$4 sm:$0xff]  }
  0x19   :  { %1264 = vmatpush3.bf16.msra.mxu1 %v1441_v23  ;;  %1243 = vmatprep.subr.bf16.mxu0 %v1442_v24  ;;  %v1493_v23 = vld [vmem:[%s1986_s0 + $0x2c] ss:$16 sps:$4 sm:$0xff]   ;;  %v102_v24 = vrot.slane %v1488_v20, %v1691_v43 }
  0x1a   :  { %1265 = vmatprep.subr.bf16.mxu1 %v1443_v25  ;;  %v116_v25 = vrot.slane %v1490_v21, %v1691_v43 }
  0x1c   :  { %1244 = vmatpush3.bf16.msra.mxu0 %v1444_v26  ;;  %v1486_v26 = vld [vmem:[%s1987_s1 + $0x100] sm:$0xff]  }
  0x1d   :  { %1266 = vmatpush3.bf16.msra.mxu1 %v1445_v27  ;;  %1245 = vmatprep.subr.bf16.mxu0 %v1446_v28  ;;  %v1487_v27 = vld [vmem:[%s1987_s1 + $0x180] sm:$0xff]   ;;  %v109_v28 = vrot.slane %v1492_v22, %v1691_v43 }
  0x1e   :  { %1267 = vmatprep.subr.bf16.mxu1 %v1447_v30  ;;  %v123_v30 = vrot.slane %v1493_v23, %v1691_v43 }
  0x20   :  { %1246 = vmatpush3.bf16.msra.mxu0 %v1448_v31  ;;  %v125_v31 = vcombine.high %v102_v24, %v116_v25  ;;  %v127_v33 = vcombine.high %v109_v28, %v123_v30  ;;  %v126_v34 = vcombine.low %v109_v28, %v123_v30  ;;  %v872_v28 = vld [vmem:[%s1989_s3] sm:$0xff]  ;;  %v975_v30 = vld [vmem:[%s1991_s5 + $0x78] sm:$0xff] }
  0x21   :  { %1268 = vmatpush3.bf16.msra.mxu1 %v1449_v32  ;;  %1275 = vmatprep.subr.bf16.mxu0 %v1456_v41  ;;  %v124_v32 = vcombine.low %v102_v24, %v116_v25 }
  0x22   :  { %1297 = vmatprep.subr.bf16.mxu1 %v1457_v42  ;;  %v141_v35 = vpack.c.bf16 %v125_v31, %v125_v31  ;;  %v143_v37 = vpack.c.bf16 %v127_v33, %v127_v33  ;;  %v142_v38 = vpack.c.bf16 %v126_v34, %v126_v34  ;;  %v974_v31 = vld [vmem:[%s1991_s5 + $0x70] sm:$0xff]  ;;  %v972_v33 = vld [vmem:[%s1991_s5 + $0x60] sm:$0xff]  ;;  %v971_v34 = vld [vmem:[%s1991_s5 + $0x58] sm:$0xff] }
  0x23   :  { %690 = vmatmul.mubr.bf16.vlgmr.msra.gmra.mxu0 %v136_v56  ;;  %v140_v36 = vpack.c.bf16 %v124_v32, %v124_v32  ;;  %v973_v32 = vld [vmem:[%s1991_s5 + $0x68] sm:$0xff] }
  0x24   :  { %730 = vmatmul.mubr.bf16.vlgmr.msra.gmra.mxu1 %v138_v57  ;;  %1276 = vmatpush3.bf16.msra.mxu0 %v1458_v52 }
  0x25   :  { %1298 = vmatpush3.bf16.msra.mxu1 %v1459_v53  ;;  %1277 = vmatprep.subr.bf16.mxu0 %v1460_v58 }
  0x26   :  { %1299 = vmatprep.subr.bf16.mxu1 %v1461_v59  ;;  %769 = vmatprep.mubr.bf16.mxu0 %v141_v35  ;;  %v970_v35 = vld [vmem:[%s1991_s5 + $0x50] sm:$0xff] }
  0x27   :  { %809 = vmatprep.mubr.bf16.mxu1 %v143_v37  ;;  %v968_v37 = vld [vmem:[%s1991_s5 + $0x40] sm:$0xff] }
  0x28   :  { %1278 = vmatpush3.bf16.msra.mxu0 %v1462_v60  ;;  %v144_v60 = vld [vmem:[#allocation2] sm:$0xff] }
  0x29   :  { %1300 = vmatpush3.bf16.msra.mxu1 %v1463_v61  ;;  %1279 = vmatprep.subr.bf16.mxu0 %v1464_v62 }
  0x2a   :  { %1301 = vmatprep.subr.bf16.mxu1 %v1465_v63 }
  0x2c   :  { %1280 = vmatpush3.bf16.msra.mxu0 %v1466_v0 }
  0x2d   :  { %1302 = vmatpush3.bf16.msra.mxu1 %v1467_v1  ;;  %1281 = vmatprep.subr.bf16.mxu0 %v1468_v2  ;;  %v1808_v1 = vand.u32 127, %v63_v29  ;;  %v1224_v2 = vld [vmem:[%s1988_s2] ss:$0 sm:$0xff] }
  0x2e   :  { %1303 = vmatprep.subr.bf16.mxu1 %v1469_v3  ;;  %v1228_v3 = vld [vmem:[%s1992_s6] ss:$0 sm:$0xff] }
  0x2f   :  { %vm835_vm1 = vcmp.ge.s32.totalorder %v1808_v1, 7  ;;  %vm836_vm2 = vcmp.lt.s32.totalorder %v1808_v1, 14  ;;  %vm834_vm4 = vcmp.lt.s32.totalorder %v1808_v1, 7  ;;  %v1055_v1 = vld [vmem:[%s1993_s7 + $0x8] sm:$0xff] }
  0x30   :  { %1282 = vmatpush3.bf16.msra.mxu0 %v1470_v4  ;;  %vm1816_vm3 = vmand %vm835_vm1, %vm836_vm2 }
  0x31   :  { %1304 = vmatpush3.bf16.msra.mxu1 %v1471_v5  ;;  %1283 = vmatprep.subr.bf16.mxu0 %v1472_v6  ;;  %vm1825_vm5 = vmor %vm834_vm4, %vm1816_vm3 }
  0x32   :  { %1305 = vmatprep.subr.bf16.mxu1 %v1473_v7 }
  0x34   :  { %1284 = vmatpush3.bf16.msra.mxu0 %v1474_v8 }
  0x35   :  { %1306 = vmatpush3.bf16.msra.mxu1 %v1475_v9  ;;  %1285 = vmatprep.subr.bf16.mxu0 %v1476_v10 }
  0x36   :  { %1307 = vmatprep.subr.bf16.mxu1 %v1477_v11 }
  0x38   :  { %1286 = vmatpush3.bf16.msra.mxu0 %v1478_v12 }
  0x39   :  { %1308 = vmatpush3.bf16.msra.mxu1 %v1479_v13  ;;  %1287 = vmatprep.subr.bf16.mxu0 %v1480_v14 }
  0x3a   :  { %1309 = vmatprep.subr.bf16.mxu1 %v1481_v15 }
  0x3c   :  { %1288 = vmatpush3.bf16.msra.mxu0 %v1482_v16 }
  0x3d   :  { %1310 = vmatpush3.bf16.msra.mxu1 %v1483_v17  ;;  %1289 = vmatprep.subr.bf16.mxu0 %v1484_v18 }
  0x3e   :  { %1311 = vmatprep.subr.bf16.mxu1 %v1485_v19 }
  0x40   :  { %1290 = vmatpush3.bf16.msra.mxu0 %v1486_v26  ;;  %v874_v26 = vld [vmem:[%s1989_s3 + $0x10] sm:$0x1f] }
  0x41   :  { %1312 = vmatpush3.bf16.msra.mxu1 %v1487_v27  ;;  %1349 = vmatprep.subr.mxu0 %v1521_v39  ;;  %v873_v27 = vld [vmem:[%s1989_s3 + $0x8] sm:$0xff] }
  0x42   :  { %1358 = vmatprep.subr.mxu1 %v1521_v39 }
  0x43   :  { %770 = vmatmul.mubr.bf16.vlgmr.msra.gmra.mxu0 %v140_v36  ;;  %v969_v36 = vld [vmem:[%s1991_s5 + $0x48] sm:$0xff] }
  0x44   :  { %810 = vmatmul.mubr.bf16.vlgmr.msra.gmra.mxu1 %v142_v38  ;;  %1350 = vmatpush3.msk.msra.mxu0 %vm885_vm6, %v874_v26  ;;  %v967_v38 = vld [vmem:[%s1991_s5 + $0x38] sm:$0xff] }
  0x45   :  { %1355 = vmatprep.mubr.msk.f32.mxu0 %vm1522_vm7, %v1521_v39  ;;  %1351 = vmatprep.subr.mxu0 %v1521_v39 }
  0x46   :  { %1390 = vmatprep.mubr.msk.f32.mxu1 %vm1522_vm7, %v1521_v39  ;;  %1352 = vmatpush3.msra.mxu0 %v873_v27 }
  0x47   :  { %1353 = vmatprep.subr.mxu0 %v1521_v39  ;;  %1359 = vmatpush3.msra.mxu1 %v975_v30 }
  0x48   :  { %1354 = vmatpush3.msra.mxu0 %v872_v28  ;;  %1360 = vmatprep.subr.mxu1 %v1521_v39 }
  0x49   :  { %1393 = vmatprep.subr.mxu0 %v1521_v39  ;;  %1361 = vmatpush3.msra.mxu1 %v974_v31 }
  0x4a   :  { %1362 = vmatprep.subr.mxu1 %v1521_v39 }
  0x4b   :  { %1363 = vmatpush3.msra.mxu1 %v973_v32 }
  0x4c   :  { %1364 = vmatprep.subr.mxu1 %v1521_v39 }
  0x4d   :  { %1365 = vmatpush3.msra.mxu1 %v972_v33 }
  0x4e   :  { %1366 = vmatprep.subr.mxu1 %v1521_v39 }
  0x4f   :  { %1367 = vmatpush3.msra.mxu1 %v971_v34 }
  0x50   :  { %1368 = vmatprep.subr.mxu1 %v1521_v39 }
  0x51   :  { %1369 = vmatpush3.msra.mxu1 %v970_v35 }
  0x52   :  { %1370 = vmatprep.subr.mxu1 %v1521_v39 }
  0x53   :  { %1371 = vmatpush3.msra.mxu1 %v969_v36 }
  0x54   :  { %1372 = vmatprep.subr.mxu1 %v1521_v39 }
  0x55   :  { %1373 = vmatpush3.msra.mxu1 %v968_v37 }
  0x56   :  { %1374 = vmatprep.subr.mxu1 %v1521_v39 }
  0x57   :  { %1375 = vmatpush3.msra.mxu1 %v967_v38 }
  0x58   :  { %1376 = vmatprep.subr.mxu1 %v1521_v39 }
  0xe3   :  { %v1247_v40 = vpop.f32.mrf.mxu0 }
  0xe4   :  { %v1269_v41 = vpop.f32.mrf.mxu1 }
  0xe5   :  { %v1248_v42 = vpop.f32.mrf.mxu0 }
  0xe6   :  { %v1270_v43 = vpop.f32.mrf.mxu1  ;;  %v1249_v48 = vadd.f32 %v1248_v42, %v1247_v40  ;;  %v966_v40 = vld [vmem:[%s1991_s5 + $0x30] sm:$0xff]  ;;  %v964_v42 = vld [vmem:[%s1991_s5 + $0x20] sm:$0xff] }
  0xe7   :  { %v1250_v44 = vpop.f32.mrf.mxu0  ;;  %v1271_v49 = vadd.f32 %v1270_v43, %v1269_v41  ;;  %v965_v41 = vld [vmem:[%s1991_s5 + $0x28] sm:$0xff]  ;;  %1377 = vmatpush3.msra.mxu1 %v966_v40  ;;  %v963_v43 = vld [vmem:[%s1991_s5 + $0x18] sm:$0xff] }
  0xe8   :  { %v1272_v45 = vpop.f32.mrf.mxu1  ;;  %1378 = vmatprep.subr.mxu1 %v1521_v39 }
  0xe9   :  { %v1251_v46 = vpop.f32.mrf.mxu0  ;;  %v732_v54 = vadd.f32 %v1271_v49, %v1249_v48  ;;  %1379 = vmatpush3.msra.mxu1 %v965_v41 }
  0xea   :  { %v1273_v47 = vpop.f32.mrf.mxu1  ;;  %1380 = vmatprep.subr.mxu1 %v1521_v39 }
  0xeb   :  { %1381 = vmatpush3.msra.mxu1 %v964_v42 }
  0xec   :  { %1382 = vmatprep.subr.mxu1 %v1521_v39 }
  0xed   :  { %1383 = vmatpush3.msra.mxu1 %v963_v43 }
  0xee   :  { %1384 = vmatprep.subr.mxu1 %v1521_v39 }
 0x103   :  { %v1291_v50 = vpop.f32.mrf.mxu0 }
 0x104   :  { %v1313_v51 = vpop.f32.mrf.mxu1 }
 0x105   :  { %v1292_v52 = vpop.f32.mrf.mxu0 }
 0x106   :  { %v1314_v53 = vpop.f32.mrf.mxu1  ;;  %v1293_v55 = vadd.f32 %v1292_v52, %v1291_v50  ;;  %v961_v52 = vld [vmem:[%s1991_s5 + $0x8] sm:$0xff] }
 0x107   :  { %v1294_v56 = vpop.f32.mrf.mxu0  ;;  %v1315_v59 = vadd.f32 %v1314_v53, %v1313_v51  ;;  %v962_v51 = vld [vmem:[%s1991_s5 + $0x10] sm:$0xff]  ;;  %v960_v53 = vld [vmem:[%s1991_s5] sm:$0xff] }
 0x108   :  { %v1316_v57 = vpop.f32.mrf.mxu1  ;;  %v772_v58 = vadd.f32 %v1293_v55, %v732_v54  ;;  %1385 = vmatpush3.msra.mxu1 %v962_v51  ;;  %v1061_v54 = vld [vmem:[%s1993_s7 + $0x38] sm:$0xff]  ;;  %v1060_v55 = vld [vmem:[%s1993_s7 + $0x30] sm:$0xff]  ;;  %v1059_v56 = vld [vmem:[%s1993_s7 + $0x28] sm:$0xff] }
 0x109   :  { %v1295_v61 = vpop.f32.mrf.mxu0  ;;  %1386 = vmatprep.subr.mxu1 %v1521_v39  ;;  %v1058_v57 = vld [vmem:[%s1993_s7 + $0x20] sm:$0xff] }
 0x10a   :  { %v1317_v62 = vpop.f32.mrf.mxu1  ;;  %v812_v63 = vadd.f32 %v1315_v59, %v772_v58  ;;  %1387 = vmatpush3.msra.mxu1 %v961_v52  ;;  %v1057_v58 = vld [vmem:[%s1993_s7 + $0x18] sm:$0xff]  ;;  %v1225_v59 = vld [vmem:[%s1990_s4] ss:$0 sm:$0xff] }
 0x10b   :  { %1388 = vmatprep.subr.mxu1 %v1521_v39 }
 0x10c   :  { %v817_v0 = vadd.f32 %v812_v63, %v144_v60  ;;  %1389 = vmatpush3.msra.mxu1 %v960_v53 }
 0x10e   :  { %819 = vst.msk [vmem:[#allocation2] sm:$0xff] %vm38_vm0, %v817_v0  ;;  %v1056_v0 = vld [vmem:[%s1993_s7 + $0x10] sm:$0xff] }
 0x115   :  { %v823_v4 = vld [vmem:[#allocation2] sm:$0xff] }
 0x116   :  { %v831_v5 = vadd.f32 %v1224_v2, %v823_v4  ;;  %v1054_v2 = vld [vmem:[%s1993_s7] sm:$0xff] }
 0x118   :  { %v842_v6 = vsel %vm1816_vm3, %v831_v5, -inf  ;;  %v838_v7 = vsel %vm834_vm4, %v831_v5, -inf  ;;  %v847_v10 = vsel %vm1825_vm5, -inf, %v831_v5 }
 0x119   :  { %v843_v8 = vsel %vm38_vm0, %v842_v6, -inf  ;;  %v839_v9 = vsel %vm38_vm0, %v838_v7, -inf  ;;  %v848_v11 = vsel %vm38_vm0, %v847_v10, -inf  ;;  %v1229_v7 = vld [vmem:[%s1994_s8] ss:$0 sm:$0xff] }
 0x11a   :  { %844 = vmax.xlane.f32.xlu0 %v843_v8  ;;  %840 = vmax.xlane.f32.xlu1 %v839_v9 }
 0x11e   :  { %849 = vmax.xlane.f32.xlu0 %v848_v11 }
 0x1a3   :  { %v845_v12 = vpop.xlane.xlu0 %844  ;;  %v841_v14 = vpop.xlane.xlu1 %840 }
 0x1a7   :  { %v850_v13 = vpop.xlane.xlu0 %849 }
 0x1a8   :  { %v851_v15 = vsel %vm1816_vm3, %v845_v12, %v850_v13 }
 0x1a9   :  { %v852_v16 = vsel %vm834_vm4, %v841_v14, %v851_v15 }
 0x1aa   :  { %v853_v17 = vsub.f32 %v831_v5, %v852_v16 }
 0x1ac   :  { %v854_v18 = vmul.f32 1.442695, %v853_v17 }
 0x1ae   :  { %1494 = vpow2.f32 %v854_v18 }
 0x1bb   :  { %v1842_v19 = vpop.eup %1494 }
 0x1bc   :  { %v864_v20 = vsel %vm1825_vm5, 0.0, %v1842_v19  ;;  %v860_v21 = vsel %vm1816_vm3, %v1842_v19, 0.0  ;;  %v856_v24 = vsel %vm834_vm4, %v1842_v19, 0.0 }
 0x1bd   :  { %v865_v22 = vsel %vm38_vm0, %v864_v20, 0.0  ;;  %v861_v23 = vsel %vm38_vm0, %v860_v21, 0.0  ;;  %v857_v25 = vsel %vm38_vm0, %v856_v24, 0.0 }
 0x1be   :  { %866 = vadd.xlane.f32.xlu0 %v865_v22  ;;  %862 = vadd.xlane.f32.xlu1 %v861_v23 }
 0x1c2   :  { %858 = vadd.xlane.f32.xlu1 %v857_v25 }
 0x247   :  { %v863_v44 = vpop.xlane.xlu1 %862  ;;  %v867_v45 = vpop.xlane.xlu0 %866 }
 0x248   :  { %v868_v46 = vsel %vm1816_vm3, %v863_v44, %v867_v45 }
 0x24b   :  { %v859_v47 = vpop.xlane.xlu1 %858 }
 0x24c   :  { %v869_v48 = vsel %vm834_vm4, %v859_v47, %v868_v46 }
 0x24d   :  { %1496 = vrcp.f32 %v869_v48 }
 0x25a   :  { %v1497_v49 = vpop.eup %1496 }
 0x25b   :  { %v871_v50 = vmul.f32 %v1497_v49, %v1842_v19 }
 0x25d   :  { %1356 = vmatmul.mubr.msk.f32.vlgmr.msra.gmra.mxu0 %vm38_vm0, %v871_v50 }
 0x25e   :  { %1409 = vmatprep.mubr.msk.f32.mxu0 %vm1522_vm7, %v1521_v39  ;;  %1394 = vmatpush3.msra.mxu0 %v1061_v54 }
 0x25f   :  { %1395 = vmatprep.subr.mxu0 %v1521_v39 }
 0x260   :  { %1396 = vmatpush3.msra.mxu0 %v1060_v55 }
 0x261   :  { %1397 = vmatprep.subr.mxu0 %v1521_v39 }
 0x262   :  { %1398 = vmatpush3.msra.mxu0 %v1059_v56 }
 0x263   :  { %1399 = vmatprep.subr.mxu0 %v1521_v39 }
 0x264   :  { %1400 = vmatpush3.msra.mxu0 %v1058_v57 }
 0x265   :  { %1401 = vmatprep.subr.mxu0 %v1521_v39 }
 0x266   :  { %1402 = vmatpush3.msra.mxu0 %v1057_v58 }
 0x267   :  { %1403 = vmatprep.subr.mxu0 %v1521_v39 }
 0x268   :  { %1404 = vmatpush3.msra.mxu0 %v1056_v0 }
 0x269   :  { %1405 = vmatprep.subr.mxu0 %v1521_v39 }
 0x26a   :  { %1406 = vmatpush3.msra.mxu0 %v1055_v1 }
 0x26b   :  { %1407 = vmatprep.subr.mxu0 %v1521_v39 }
 0x26c   :  { %1408 = vmatpush3.msra.mxu0 %v1054_v2 }
 0x31d   :  { %v955_v60 = vpop.f32.mrf.mxu0 }
 0x31e   :  { %v956_v61 = vadd.f32 %v1225_v59, %v955_v60 }
 0x31f   :  { %v1357_v62 = vpop.f32.mrf.mxu0 }
 0x320   :  { %v959_v63 = vmax.f32 %v956_v61, 0.0 }
 0x322   :  { %1391 = vmatmul.mubr.f32.vlgmr.msra.gmra.mxu1 %v959_v63 }
 0x3e2   :  { %v1049_v4 = vpop.f32.mrf.mxu1 }
 0x3e3   :  { %v1050_v5 = vadd.f32 %v1228_v3, %v1049_v4 }
 0x3e4   :  { %v1392_v29 = vpop.f32.mrf.mxu1 }
 0x3e5   :  { %v1053_v6 = vmax.f32 %v1050_v5, 0.0 }
 0x3e7   :  { %1410 = vmatmul.mubr.msk.f32.vlgmr.msra.gmra.mxu0 %vm1069_vm8, %v1053_v6 }
 0x4a7   :  { %v1139_v39 = vpop.f32.mrf.mxu0 }
 0x4a8   :  { %v1140_v8 = vadd.f32 %v1229_v7, %v1139_v39 }
 0x4a9   :  { %v1411_v9 = vpop.f32.mrf.mxu0 }
 0x4aa   :  { %1143 = vst [vmem:[#allocation3] sm:$0xff] %v1140_v8 }
 0x4ab   :  { %1148 = vsyncadd [#allocation4], 96  ;;  %s1523_s7 = smov [#allocation3]  }
 0x4ac   :  { %s1149_s13 = sshll.u32 %s1523_s7, 4  ;;  %s1150_s13 = int_to_ptr.vmem [resolvable:$true] %s1149_s13 }
 0x4ad   :  { %s1498_s14 = scalar_lea.vmem %s1150_s13, 32  ;;  %s1502_s6 = scalar_lea.vmem %s1150_s13, 128 }
 0x4ae   :  { %p1499_p0 = scmp.ne.s32.totalorder %s1150_s13, %s1498_s14  ;;  %p1503_p1 = scmp.lt.s32.totalorder %s1150_s13, %s1150_s13 }
 0x4af   :  { %p1504_p2 = scmp.lt.s32.totalorder %s1502_s6, %s1498_s14 }
 0x4b1   :  { %p1505_p3 = por %p1504_p2, %p1503_p1 }
 0x4b3   :  { %p1506_p4 = pnand %p1505_p3, %p1499_p0 }
 0x4b5   :  { %1509 = shalt.err (!%p1506_p4)
}
 0x4b6   :  { %s1524_s3 = smov 32   ;;  %s1525_s15 = smov 2  }
 0x4b7   :  { %1155 = dma.vmem_to_hbm [thread:$0]  %s1150_s13, 32, %s1995_s9, [#allocation4], %s1524_s3, %s1524_s3, %s1525_s15  }
 0x4b8   :  { %1518 = dma.done.wait [#allocation4], 128  }
 0x4b9   :  { %1519 = vsyncadd [#allocation4], 4294967168 }
 0x4ba   :  { %1159 = vsyncpa [#allocation4], 1 }

</bundles_post_ra>
